<compile_context>
chip_gen: v7x
topology: tpu7x:2x2x1
jax: 0.10.0
libtpu: 0.0.40
codegen_flags: <defaults>
</compile_context>

<pallas_src>
import functools

import jax
import jax.numpy as jnp
from jax.experimental import pallas as pl
from jax.experimental.pallas import tpu as pltpu

EPS = 1e-5
LANE = 128
SUBLANE = 8


def _round_up(x, m):
    return (x + m - 1) // m * m


def _vmem_limit_bytes():
    # v5e/v6e have 128 MiB physical VMEM -> allow 64 MiB scoped; v7x has only
    # 64 MiB physical -> keep a 32 MiB scoped limit.
    try:
        cap = pltpu.get_tpu_info().vmem_capacity_bytes
    except Exception:  # pragma: no cover - conservative default
        cap = 0
    return 64 * 1024 * 1024 if cap >= 100 * 1024 * 1024 else 32 * 1024 * 1024


# ---------------------------------------------------------------------------
# Pass 1: in-kernel 9-tap conv-as-matmul (f32 VMEM accumulator, resident
#         weight) + per-image BatchNorm partial stats over valid rows.
# ---------------------------------------------------------------------------
def _conv_stats_kernel(x_ref, w_ref, y_ref, stats_ref, acc_ref, *,
                       tap_offsets, mrow, wq, wo, ho):
    """x_ref:     (1, s*s*Lq_pad, Cin_pad) bf16 phase-flattened padded image
       w_ref:     (9, Cin_pad, Cpad)       bf16 conv weight (tap-major), resident
       y_ref:     (1, mrow, Cpad)          bf16 conv rows (incl. junk columns)
       stats_ref: (1, 2, Cpad)             f32  row0=sum(y), row1=sum(y*y) (valid rows)
       acc_ref:   (mrow, Cpad)             f32  VMEM accumulator scratch
    """
    for t, off in enumerate(tap_offsets):          # 9 static taps, static slices
        contrib = jnp.dot(x_ref[0, off:off + mrow, :], w_ref[t],
                          preferred_element_type=jnp.float32)
        if t == 0:
            acc_ref[...] = contrib
        else:
            acc_ref[...] += contrib

    acc = acc_ref[...]
    y_ref[0] = acc.astype(y_ref.dtype)

    # Valid rows are r = oh*Wq + ow with ow < Wo, oh < Ho; junk columns from the
    # phase-flattened layout and sublane-pad rows are masked out of the stats.
    r = jax.lax.broadcasted_iota(jnp.int32, (mrow, 1), 0)
    valid = jnp.logical_and(r % wq < wo, r < ho * wq)
    yv = jnp.where(valid, acc, 0.0)
    stats_ref[0, 0:1, :] = jnp.sum(yv, axis=0, keepdims=True)
    stats_ref[0, 1:2, :] = jnp.sum(yv * yv, axis=0, keepdims=True)


# ---------------------------------------------------------------------------
# Pass 2: folded BatchNorm affine (y*scale + shift) + ReLU, bf16 streaming.
# ---------------------------------------------------------------------------
def _bn_relu_kernel(y_ref, scale_ref, shift_ref, o_ref):
    y = y_ref[...].astype(jnp.float32)
    o_ref[...] = jnp.maximum(y * scale_ref[...] + shift_ref[...],
                             0.0).astype(o_ref.dtype)


# ---------------------------------------------------------------------------
# One Conv(3x3, pad=1, stride) -> BN(train) -> ReLU stage.
# ---------------------------------------------------------------------------
def conv_bn_relu(x_nhwc, w_oihw, gamma, beta, stride, *, out_dtype, vmem_limit):
    N, H, W, C = x_nhwc.shape
    Cout, Cin, kh, kw = w_oihw.shape
    assert (kh, kw) == (3, 3) and Cin == C
    s = stride
    Ho = (H - 1) // s + 1
    Wo = (W - 1) // s + 1
    Hq = 2 // s + Ho
    Wq = 2 // s + Wo

    Cin_pad = _round_up(C, LANE)
    # NOTE: on v6e/v7x a 256-multiple Cpad fills the 256-wide MXU; we keep 128
    # to avoid extra padded work for narrow layers.
    Cpad = _round_up(Cout, LANE)

    # ---- phase-decomposed, flattened input (one HBM copy, folds transpose /
    #      channel pad / bf16 cast).  x_ph[n,rh,rw,qh,qw,c] = xpad[n,s*qh+rh,s*qw+rw,c]
    Th, Tw = s * Hq, s * Wq
    xp = jnp.pad(x_nhwc, ((0, 0), (1, 1), (1, 1), (0, Cin_pad - C)))
    xp = xp[:, :Th, :Tw, :]
    xp = jnp.pad(xp, ((0, 0), (0, Th - xp.shape[1]), (0, Tw - xp.shape[2]), (0, 0)))
    x_ph = xp.reshape(N, Hq, s, Wq, s, Cin_pad).transpose(0, 2, 4, 1, 3, 5)

    mrow = _round_up(Ho * Wq, SUBLANE)             # matmul rows / image (incl. junk cols)
    max_start = (2 // s) * Wq + (2 // s)
    Lq_pad = _round_up(max_start + mrow, SUBLANE)  # per-phase segment length
    x_ph = x_ph.reshape(N, s * s, Hq * Wq, Cin_pad)
    x_ph = jnp.pad(x_ph, ((0, 0), (0, 0), (0, Lq_pad - Hq * Wq), (0, 0)))
    x_flat = x_ph.reshape(N, s * s * Lq_pad, Cin_pad).astype(jnp.bfloat16)

    # Tap t = 3*ki + kj reads rows [off_t, off_t + mrow) of x_flat (static).
    tap_offsets = tuple(
        ((ki % s) * s + (kj % s)) * Lq_pad + (ki // s) * Wq + (kj // s)
        for ki in range(3) for kj in range(3))

    # Resident conv weight (fetched once thanks to the constant index_map).
    w9 = jnp.transpose(w_oihw, (2, 3, 1, 0)).reshape(9, Cin, Cout)
    w9 = jnp.pad(w9, ((0, 0), (0, Cin_pad - Cin), (0, Cpad - Cout))).astype(jnp.bfloat16)

    kernel = functools.partial(_conv_stats_kernel, tap_offsets=tap_offsets,
                               mrow=mrow, wq=Wq, wo=Wo, ho=Ho)
    y, part_stats = pl.pallas_call(
        kernel,
        out_shape=(
            jax.ShapeDtypeStruct((N, mrow, Cpad), jnp.bfloat16),
            jax.ShapeDtypeStruct((N, 2, Cpad), jnp.float32),
        ),
        grid=(N,),
        in_specs=[
            pl.BlockSpec((1, s * s * Lq_pad, Cin_pad), lambda n: (n, 0, 0)),
            pl.BlockSpec((9, Cin_pad, Cpad), lambda n: (0, 0, 0)),
        ],
        out_specs=(
            pl.BlockSpec((1, mrow, Cpad), lambda n: (n, 0, 0)),
            pl.BlockSpec((1, 2, Cpad), lambda n: (n, 0, 0)),
        ),
        scratch_shapes=[pltpu.VMEM((mrow, Cpad), jnp.float32)],
        compiler_params=pltpu.CompilerParams(
            dimension_semantics=("parallel",),
            vmem_limit_bytes=vmem_limit),
    )(x_flat, w9)

    # Tiny per-channel combine + train-mode BN affine fold (biased variance
    # over the N*Ho*Wo valid positions).
    cnt = N * Ho * Wo
    ssum = jnp.sum(part_stats, axis=0)
    mean = ssum[0] / cnt
    var = jnp.maximum(ssum[1] / cnt - mean * mean, 0.0)
    g = jnp.pad(gamma.astype(jnp.float32), (0, Cpad - Cout))
    b = jnp.pad(beta.astype(jnp.float32), (0, Cpad - Cout))
    scale = g * jax.lax.rsqrt(var + EPS)
    shift = b - mean * scale

    out = pl.pallas_call(
        _bn_relu_kernel,
        out_shape=jax.ShapeDtypeStruct((N, mrow, Cpad), out_dtype),
        grid=(N,),
        in_specs=[
            pl.BlockSpec((1, mrow, Cpad), lambda n: (n, 0, 0)),
            pl.BlockSpec((1, 1, Cpad), lambda n: (0, 0, 0)),
            pl.BlockSpec((1, 1, Cpad), lambda n: (0, 0, 0)),
        ],
        out_specs=pl.BlockSpec((1, mrow, Cpad), lambda n: (n, 0, 0)),
        compiler_params=pltpu.CompilerParams(
            dimension_semantics=("parallel",),
            vmem_limit_bytes=vmem_limit),
    )(y, scale.reshape(1, 1, Cpad), shift.reshape(1, 1, Cpad))

    # Strip junk columns, sublane-pad rows and channel padding -> NHWC.
    out = out[:, :Ho * Wq, :].reshape(N, Ho, Wq, Cpad)[:, :, :Wo, :Cout]
    return out


def block_forward(x_nchw, params, stride):
    # NCHW in / NCHW out (PyTorch convention); channel-last (lane-dense) inside.
    x = jnp.transpose(x_nchw, (0, 2, 3, 1))
    vmem_limit = _vmem_limit_bytes()
    # Conv bias intentionally not applied: train-mode BatchNorm's mean
    # subtraction removes a per-channel bias exactly, so the output is unchanged.
    h = conv_bn_relu(x, params["w1"], params["g1"], params["beta1"], stride,
                     out_dtype=jnp.bfloat16, vmem_limit=vmem_limit)
    h = conv_bn_relu(h, params["w2"], params["g2"], params["beta2"], stride,
                     out_dtype=jnp.float32, vmem_limit=vmem_limit)
    return jnp.transpose(h, (0, 3, 1, 2))


def block_reference(x_nchw, params, stride):
    """Pure-JAX f32 reference mirroring the PyTorch forward (train-mode BN)."""
    def stage(x, w, b, g, beta):
        y = jax.lax.conv_general_dilated(
            x, w, (stride, stride), ((1, 1), (1, 1)),
            dimension_numbers=("NCHW", "OIHW", "NCHW"))
        y = y + b.reshape(1, -1, 1, 1)
        mean = jnp.mean(y, axis=(0, 2, 3), keepdims=True)
        var = jnp.mean(jnp.square(y - mean), axis=(0, 2, 3), keepdims=True)
        y_hat = (y - mean) / jnp.sqrt(var + EPS)
        return jnp.maximum(
            y_hat * g.reshape(1, -1, 1, 1) + beta.reshape(1, -1, 1, 1), 0.0)

    h = stage(x_nchw, params["w1"], params["b1"], params["g1"], params["beta1"])
    h = stage(h, params["w2"], params["b2"], params["g2"], params["beta2"])
    return h


def init_params(key, n_input, n_output):
    k1, k2, k3, k4, k5, k6 = jax.random.split(key, 6)
    return {
        "w1": 0.1 * jax.random.normal(k1, (n_output, n_input, 3, 3), jnp.float32),
        "b1": 0.05 * jax.random.normal(k2, (n_output,), jnp.float32),
        "g1": 1.0 + 0.1 * jax.random.normal(k3, (n_output,), jnp.float32),
        "beta1": 0.05 * jax.random.normal(k4, (n_output,), jnp.float32),
        "w2": 0.1 * jax.random.normal(k5, (n_output, n_output, 3, 3), jnp.float32),
        "b2": 0.05 * jax.random.normal(k6, (n_output,), jnp.float32),
        "g2": jnp.ones((n_output,), jnp.float32),
        "beta2": jnp.zeros((n_output,), jnp.float32),
    }


if __name__ == "__main__":
    key = jax.random.PRNGKey(0)
    kx, kp = jax.random.split(key)

    n_input, n_output, stride = 4, 8, 2
    x = jax.random.normal(kx, (2, n_input, 16, 16), jnp.float32)  # NCHW
    params = init_params(kp, n_input, n_output)

    fwd = jax.jit(functools.partial(block_forward, stride=stride))
    out = jax.block_until_ready(fwd(x, params))

    ref = jax.block_until_ready(block_reference(x, params, stride))
    assert out.shape == ref.shape == (2, n_output, 4, 4), (out.shape, ref.shape)
    # bf16 MXU operands / bf16 inter-stage activations (f32 accumulation and
    # f32 BN stats) -> compare with a bf16-aware tolerance.
    err = float(jnp.max(jnp.abs(out - ref)))
    assert jnp.allclose(out, ref, rtol=5e-2, atol=5e-2), err

    print("KERNEL_OK")
</pallas_src>

<mosaic_0001>
module attributes {stable_mosaic.version = 11 : i64} {
  func.func @_bn_relu_kernel(%arg0: i32, %arg1: memref<1x72x128xbf16, #tpu.memory_space<vmem>>, %arg2: memref<1x1x128xf32, #tpu.memory_space<vmem>>, %arg3: memref<1x1x128xf32, #tpu.memory_space<vmem>>, %arg4: memref<1x72x128xbf16, #tpu.memory_space<vmem>>) attributes {dimension_semantics = [#tpu.dimension_semantics<parallel>], iteration_bounds = array<i64: 2>, scalar_prefetch = 0 : i64, scratch_operands = 0 : i64, tpu.core_type = #tpu.core_type<tc>, window_params = [{transform_indices = @transform_0, window_bounds = array<i64: 1, 72, 128>}, {pipeline_mode = #tpu.pipeline_mode<synchronous>, transform_indices = @transform_1, window_bounds = array<i64: 1, 1, 128>}, {pipeline_mode = #tpu.pipeline_mode<synchronous>, transform_indices = @transform_2, window_bounds = array<i64: 1, 1, 128>}, {transform_indices = @transform_3, window_bounds = array<i64: 1, 72, 128>}]} {
    %c0 = arith.constant 0 : index
    %c0_0 = arith.constant 0 : index
    %c0_1 = arith.constant 0 : index
    %0 = vector.load %arg1[%c0, %c0_0, %c0_1] : memref<1x72x128xbf16, #tpu.memory_space<vmem>>, vector<1x72x128xbf16>
    %1 = arith.extf %0 : vector<1x72x128xbf16> to vector<1x72x128xf32>
    %c0_2 = arith.constant 0 : index
    %c0_3 = arith.constant 0 : index
    %c0_4 = arith.constant 0 : index
    %2 = vector.load %arg2[%c0_2, %c0_3, %c0_4] : memref<1x1x128xf32, #tpu.memory_space<vmem>>, vector<1x1x128xf32>
    %3 = vector.broadcast %2 : vector<1x1x128xf32> to vector<1x72x128xf32>
    %4 = arith.mulf %1, %3 : vector<1x72x128xf32>
    %c0_5 = arith.constant 0 : index
    %c0_6 = arith.constant 0 : index
    %c0_7 = arith.constant 0 : index
    %5 = vector.load %arg3[%c0_5, %c0_6, %c0_7] : memref<1x1x128xf32, #tpu.memory_space<vmem>>, vector<1x1x128xf32>
    %6 = vector.broadcast %5 : vector<1x1x128xf32> to vector<1x72x128xf32>
    %7 = arith.addf %4, %6 : vector<1x72x128xf32>
    %cst = arith.constant 0.000000e+00 : f32
    %8 = vector.broadcast %cst : f32 to vector<1x72x128xf32>
    %9 = arith.maximumf %7, %8 : vector<1x72x128xf32>
    %10 = arith.truncf %9 : vector<1x72x128xf32> to vector<1x72x128xbf16>
    %c0_8 = arith.constant 0 : index
    %c0_9 = arith.constant 0 : index
    %c0_10 = arith.constant 0 : index
    %11 = vector.load %arg4[%c0_8, %c0_9, %c0_10] : memref<1x72x128xbf16, #tpu.memory_space<vmem>>, vector<1x72x128xbf16>
    tpu.vector_store %arg4[%c0_8, %c0_9, %c0_10], %10 {strides = array<i32>} : memref<1x72x128xbf16, #tpu.memory_space<vmem>>, vector<1x72x128xbf16>,
    return
  }
  func.func @transform_0(%arg0: i32) -> (i32, i32, i32) {
    %c0_i32 = arith.constant 0 : i32
    %c0_i32_0 = arith.constant 0 : i32
    %c0_i32_1 = arith.constant 0 : i32
    return %arg0, %c0_i32, %c0_i32_0 : i32, i32, i32
  }
  func.func @transform_1(%arg0: i32) -> (i32, i32, i32) {
    %c0_i32 = arith.constant 0 : i32
    %c0_i32_0 = arith.constant 0 : i32
    %c0_i32_1 = arith.constant 0 : i32
    %c0_i32_2 = arith.constant 0 : i32
    return %c0_i32, %c0_i32_0, %c0_i32_1 : i32, i32, i32
  }
  func.func @transform_2(%arg0: i32) -> (i32, i32, i32) {
    %c0_i32 = arith.constant 0 : i32
    %c0_i32_0 = arith.constant 0 : i32
    %c0_i32_1 = arith.constant 0 : i32
    %c0_i32_2 = arith.constant 0 : i32
    return %c0_i32, %c0_i32_0, %c0_i32_1 : i32, i32, i32
  }
  func.func @transform_3(%arg0: i32) -> (i32, i32, i32) {
    %c0_i32 = arith.constant 0 : i32
    %c0_i32_0 = arith.constant 0 : i32
    %c0_i32_1 = arith.constant 0 : i32
    return %arg0, %c0_i32, %c0_i32_0 : i32, i32, i32
  }
}

module attributes {stable_mosaic.version = 11 : i64} {
  func.func @_conv_stats_kernel(%arg0: i32, %arg1: memref<1x352x128xbf16, #tpu.memory_space<vmem>>, %arg2: memref<9x128x128xbf16, #tpu.memory_space<vmem>>, %arg3: memref<1x72x128xbf16, #tpu.memory_space<vmem>>, %arg4: memref<1x2x128xf32, #tpu.memory_space<vmem>>, %arg5: memref<72x128xf32, #tpu.memory_space<vmem>>) attributes {dimension_semantics = [#tpu.dimension_semantics<parallel>], iteration_bounds = array<i64: 2>, scalar_prefetch = 0 : i64, scratch_operands = 1 : i64, tpu.core_type = #tpu.core_type<tc>, window_params = [{transform_indices = @transform_0, window_bounds = array<i64: 1, 352, 128>}, {pipeline_mode = #tpu.pipeline_mode<synchronous>, transform_indices = @transform_1, window_bounds = array<i64: 9, 128, 128>}, {transform_indices = @transform_2, window_bounds = array<i64: 1, 72, 128>}, {transform_indices = @transform_3, window_bounds = array<i64: 1, 2, 128>}]} {
    %c0 = arith.constant 0 : index
    %c0_0 = arith.constant 0 : index
    %c0_1 = arith.constant 0 : index
    %0 = vector.load %arg1[%c0, %c0_0, %c0_1] : memref<1x352x128xbf16, #tpu.memory_space<vmem>>, vector<1x72x128xbf16>
    %1 = vector.shape_cast %0 : vector<1x72x128xbf16> to vector<72x128xbf16>
    %c0_2 = arith.constant 0 : index
    %c0_3 = arith.constant 0 : index
    %c0_4 = arith.constant 0 : index
    %2 = vector.load %arg2[%c0_2, %c0_3, %c0_4] : memref<9x128x128xbf16, #tpu.memory_space<vmem>>, vector<1x128x128xbf16>
    %3 = vector.shape_cast %2 : vector<1x128x128xbf16> to vector<128x128xbf16>
    %cst = arith.constant dense<0.000000e+00> : vector<72x128xf32>
    %4 = tpu.matmul %1, %3, %cst {dimension_numbers = #tpu.dot_dimension_numbers<[1], [0], [0], [1], [0, 0, 1, 1], [], []>} : vector<72x128xbf16>, vector<128x128xbf16>, vector<72x128xf32> -> vector<72x128xf32>
    %c0_5 = arith.constant 0 : index
    %c0_6 = arith.constant 0 : index
    %5 = vector.load %arg5[%c0_5, %c0_6] : memref<72x128xf32, #tpu.memory_space<vmem>>, vector<72x128xf32>
    tpu.vector_store %arg5[%c0_5, %c0_6], %4 {strides = array<i32>} : memref<72x128xf32, #tpu.memory_space<vmem>>, vector<72x128xf32>,
    %c0_7 = arith.constant 0 : index
    %c88 = arith.constant 88 : index
    %c0_8 = arith.constant 0 : index
    %6 = vector.load %arg1[%c0_7, %c88, %c0_8] : memref<1x352x128xbf16, #tpu.memory_space<vmem>>, vector<1x72x128xbf16>
    %7 = vector.shape_cast %6 : vector<1x72x128xbf16> to vector<72x128xbf16>
    %c1 = arith.constant 1 : index
    %c0_9 = arith.constant 0 : index
    %c0_10 = arith.constant 0 : index
    %8 = vector.load %arg2[%c1, %c0_9, %c0_10] : memref<9x128x128xbf16, #tpu.memory_space<vmem>>, vector<1x128x128xbf16>
    %9 = vector.shape_cast %8 : vector<1x128x128xbf16> to vector<128x128xbf16>
    %cst_11 = arith.constant dense<0.000000e+00> : vector<72x128xf32>
    %10 = tpu.matmul %7, %9, %cst_11 {dimension_numbers = #tpu.dot_dimension_numbers<[1], [0], [0], [1], [0, 0, 1, 1], [], []>} : vector<72x128xbf16>, vector<128x128xbf16>, vector<72x128xf32> -> vector<72x128xf32>
    %c0_12 = arith.constant 0 : index
    %c0_13 = arith.constant 0 : index
    %11 = vector.load %arg5[%c0_12, %c0_13] : memref<72x128xf32, #tpu.memory_space<vmem>>, vector<72x128xf32>
    %12 = arith.addf %11, %10 : vector<72x128xf32>
    %c0_14 = arith.constant 0 : index
    %c0_15 = arith.constant 0 : index
    %13 = vector.load %arg5[%c0_14, %c0_15] : memref<72x128xf32, #tpu.memory_space<vmem>>, vector<72x128xf32>
    tpu.vector_store %arg5[%c0_14, %c0_15], %12 {strides = array<i32>} : memref<72x128xf32, #tpu.memory_space<vmem>>, vector<72x128xf32>,
    %c0_16 = arith.constant 0 : index
    %c1_17 = arith.constant 1 : index
    %c0_18 = arith.constant 0 : index
    %14 = vector.load %arg1[%c0_16, %c1_17, %c0_18] : memref<1x352x128xbf16, #tpu.memory_space<vmem>>, vector<1x72x128xbf16>
    %15 = vector.shape_cast %14 : vector<1x72x128xbf16> to vector<72x128xbf16>
    %c2 = arith.constant 2 : index
    %c0_19 = arith.constant 0 : index
    %c0_20 = arith.constant 0 : index
    %16 = vector.load %arg2[%c2, %c0_19, %c0_20] : memref<9x128x128xbf16, #tpu.memory_space<vmem>>, vector<1x128x128xbf16>
    %17 = vector.shape_cast %16 : vector<1x128x128xbf16> to vector<128x128xbf16>
    %cst_21 = arith.constant dense<0.000000e+00> : vector<72x128xf32>
    %18 = tpu.matmul %15, %17, %cst_21 {dimension_numbers = #tpu.dot_dimension_numbers<[1], [0], [0], [1], [0, 0, 1, 1], [], []>} : vector<72x128xbf16>, vector<128x128xbf16>, vector<72x128xf32> -> vector<72x128xf32>
    %c0_22 = arith.constant 0 : index
    %c0_23 = arith.constant 0 : index
    %19 = vector.load %arg5[%c0_22, %c0_23] : memref<72x128xf32, #tpu.memory_space<vmem>>, vector<72x128xf32>
    %20 = arith.addf %19, %18 : vector<72x128xf32>
    %c0_24 = arith.constant 0 : index
    %c0_25 = arith.constant 0 : index
    %21 = vector.load %arg5[%c0_24, %c0_25] : memref<72x128xf32, #tpu.memory_space<vmem>>, vector<72x128xf32>
    tpu.vector_store %arg5[%c0_24, %c0_25], %20 {strides = array<i32>} : memref<72x128xf32, #tpu.memory_space<vmem>>, vector<72x128xf32>,
    %c0_26 = arith.constant 0 : index
    %c176 = arith.constant 176 : index
    %c0_27 = arith.constant 0 : index
    %22 = vector.load %arg1[%c0_26, %c176, %c0_27] : memref<1x352x128xbf16, #tpu.memory_space<vmem>>, vector<1x72x128xbf16>
    %23 = vector.shape_cast %22 : vector<1x72x128xbf16> to vector<72x128xbf16>
    %c3 = arith.constant 3 : index
    %c0_28 = arith.constant 0 : index
    %c0_29 = arith.constant 0 : index
    %24 = vector.load %arg2[%c3, %c0_28, %c0_29] : memref<9x128x128xbf16, #tpu.memory_space<vmem>>, vector<1x128x128xbf16>
    %25 = vector.shape_cast %24 : vector<1x128x128xbf16> to vector<128x128xbf16>
    %cst_30 = arith.constant dense<0.000000e+00> : vector<72x128xf32>
    %26 = tpu.matmul %23, %25, %cst_30 {dimension_numbers = #tpu.dot_dimension_numbers<[1], [0], [0], [1], [0, 0, 1, 1], [], []>} : vector<72x128xbf16>, vector<128x128xbf16>, vector<72x128xf32> -> vector<72x128xf32>
    %c0_31 = arith.constant 0 : index
    %c0_32 = arith.constant 0 : index
    %27 = vector.load %arg5[%c0_31, %c0_32] : memref<72x128xf32, #tpu.memory_space<vmem>>, vector<72x128xf32>
    %28 = arith.addf %27, %26 : vector<72x128xf32>
    %c0_33 = arith.constant 0 : index
    %c0_34 = arith.constant 0 : index
    %29 = vector.load %arg5[%c0_33, %c0_34] : memref<72x128xf32, #tpu.memory_space<vmem>>, vector<72x128xf32>
    tpu.vector_store %arg5[%c0_33, %c0_34], %28 {strides = array<i32>} : memref<72x128xf32, #tpu.memory_space<vmem>>, vector<72x128xf32>,
    %c0_35 = arith.constant 0 : index
    %c264 = arith.constant 264 : index
    %c0_36 = arith.constant 0 : index
    %30 = vector.load %arg1[%c0_35, %c264, %c0_36] : memref<1x352x128xbf16, #tpu.memory_space<vmem>>, vector<1x72x128xbf16>
    %31 = vector.shape_cast %30 : vector<1x72x128xbf16> to vector<72x128xbf16>
    %c4 = arith.constant 4 : index
    %c0_37 = arith.constant 0 : index
    %c0_38 = arith.constant 0 : index
    %32 = vector.load %arg2[%c4, %c0_37, %c0_38] : memref<9x128x128xbf16, #tpu.memory_space<vmem>>, vector<1x128x128xbf16>
    %33 = vector.shape_cast %32 : vector<1x128x128xbf16> to vector<128x128xbf16>
    %cst_39 = arith.constant dense<0.000000e+00> : vector<72x128xf32>
    %34 = tpu.matmul %31, %33, %cst_39 {dimension_numbers = #tpu.dot_dimension_numbers<[1], [0], [0], [1], [0, 0, 1, 1], [], []>} : vector<72x128xbf16>, vector<128x128xbf16>, vector<72x128xf32> -> vector<72x128xf32>
    %c0_40 = arith.constant 0 : index
    %c0_41 = arith.constant 0 : index
    %35 = vector.load %arg5[%c0_40, %c0_41] : memref<72x128xf32, #tpu.memory_space<vmem>>, vector<72x128xf32>
    %36 = arith.addf %35, %34 : vector<72x128xf32>
    %c0_42 = arith.constant 0 : index
    %c0_43 = arith.constant 0 : index
    %37 = vector.load %arg5[%c0_42, %c0_43] : memref<72x128xf32, #tpu.memory_space<vmem>>, vector<72x128xf32>
    tpu.vector_store %arg5[%c0_42, %c0_43], %36 {strides = array<i32>} : memref<72x128xf32, #tpu.memory_space<vmem>>, vector<72x128xf32>,
    %c0_44 = arith.constant 0 : index
    %c177 = arith.constant 177 : index
    %c0_45 = arith.constant 0 : index
    %38 = vector.load %arg1[%c0_44, %c177, %c0_45] : memref<1x352x128xbf16, #tpu.memory_space<vmem>>, vector<1x72x128xbf16>
    %39 = vector.shape_cast %38 : vector<1x72x128xbf16> to vector<72x128xbf16>
    %c5 = arith.constant 5 : index
    %c0_46 = arith.constant 0 : index
    %c0_47 = arith.constant 0 : index
    %40 = vector.load %arg2[%c5, %c0_46, %c0_47] : memref<9x128x128xbf16, #tpu.memory_space<vmem>>, vector<1x128x128xbf16>
    %41 = vector.shape_cast %40 : vector<1x128x128xbf16> to vector<128x128xbf16>
    %cst_48 = arith.constant dense<0.000000e+00> : vector<72x128xf32>
    %42 = tpu.matmul %39, %41, %cst_48 {dimension_numbers = #tpu.dot_dimension_numbers<[1], [0], [0], [1], [0, 0, 1, 1], [], []>} : vector<72x128xbf16>, vector<128x128xbf16>, vector<72x128xf32> -> vector<72x128xf32>
    %c0_49 = arith.constant 0 : index
    %c0_50 = arith.constant 0 : index
    %43 = vector.load %arg5[%c0_49, %c0_50] : memref<72x128xf32, #tpu.memory_space<vmem>>, vector<72x128xf32>
    %44 = arith.addf %43, %42 : vector<72x128xf32>
    %c0_51 = arith.constant 0 : index
    %c0_52 = arith.constant 0 : index
    %45 = vector.load %arg5[%c0_51, %c0_52] : memref<72x128xf32, #tpu.memory_space<vmem>>, vector<72x128xf32>
    tpu.vector_store %arg5[%c0_51, %c0_52], %44 {strides = array<i32>} : memref<72x128xf32, #tpu.memory_space<vmem>>, vector<72x128xf32>,
    %c0_53 = arith.constant 0 : index
    %c9 = arith.constant 9 : index
    %c0_54 = arith.constant 0 : index
    %46 = vector.load %arg1[%c0_53, %c9, %c0_54] : memref<1x352x128xbf16, #tpu.memory_space<vmem>>, vector<1x72x128xbf16>
    %47 = vector.shape_cast %46 : vector<1x72x128xbf16> to vector<72x128xbf16>
    %c6 = arith.constant 6 : index
    %c0_55 = arith.constant 0 : index
    %c0_56 = arith.constant 0 : index
    %48 = vector.load %arg2[%c6, %c0_55, %c0_56] : memref<9x128x128xbf16, #tpu.memory_space<vmem>>, vector<1x128x128xbf16>
    %49 = vector.shape_cast %48 : vector<1x128x128xbf16> to vector<128x128xbf16>
    %cst_57 = arith.constant dense<0.000000e+00> : vector<72x128xf32>
    %50 = tpu.matmul %47, %49, %cst_57 {dimension_numbers = #tpu.dot_dimension_numbers<[1], [0], [0], [1], [0, 0, 1, 1], [], []>} : vector<72x128xbf16>, vector<128x128xbf16>, vector<72x128xf32> -> vector<72x128xf32>
    %c0_58 = arith.constant 0 : index
    %c0_59 = arith.constant 0 : index
    %51 = vector.load %arg5[%c0_58, %c0_59] : memref<72x128xf32, #tpu.memory_space<vmem>>, vector<72x128xf32>
    %52 = arith.addf %51, %50 : vector<72x128xf32>
    %c0_60 = arith.constant 0 : index
    %c0_61 = arith.constant 0 : index
    %53 = vector.load %arg5[%c0_60, %c0_61] : memref<72x128xf32, #tpu.memory_space<vmem>>, vector<72x128xf32>
    tpu.vector_store %arg5[%c0_60, %c0_61], %52 {strides = array<i32>} : memref<72x128xf32, #tpu.memory_space<vmem>>, vector<72x128xf32>,
    %c0_62 = arith.constant 0 : index
    %c97 = arith.constant 97 : index
    %c0_63 = arith.constant 0 : index
    %54 = vector.load %arg1[%c0_62, %c97, %c0_63] : memref<1x352x128xbf16, #tpu.memory_space<vmem>>, vector<1x72x128xbf16>
    %55 = vector.shape_cast %54 : vector<1x72x128xbf16> to vector<72x128xbf16>
    %c7 = arith.constant 7 : index
    %c0_64 = arith.constant 0 : index
    %c0_65 = arith.constant 0 : index
    %56 = vector.load %arg2[%c7, %c0_64, %c0_65] : memref<9x128x128xbf16, #tpu.memory_space<vmem>>, vector<1x128x128xbf16>
    %57 = vector.shape_cast %56 : vector<1x128x128xbf16> to vector<128x128xbf16>
    %cst_66 = arith.constant dense<0.000000e+00> : vector<72x128xf32>
    %58 = tpu.matmul %55, %57, %cst_66 {dimension_numbers = #tpu.dot_dimension_numbers<[1], [0], [0], [1], [0, 0, 1, 1], [], []>} : vector<72x128xbf16>, vector<128x128xbf16>, vector<72x128xf32> -> vector<72x128xf32>
    %c0_67 = arith.constant 0 : index
    %c0_68 = arith.constant 0 : index
    %59 = vector.load %arg5[%c0_67, %c0_68] : memref<72x128xf32, #tpu.memory_space<vmem>>, vector<72x128xf32>
    %60 = arith.addf %59, %58 : vector<72x128xf32>
    %c0_69 = arith.constant 0 : index
    %c0_70 = arith.constant 0 : index
    %61 = vector.load %arg5[%c0_69, %c0_70] : memref<72x128xf32, #tpu.memory_space<vmem>>, vector<72x128xf32>
    tpu.vector_store %arg5[%c0_69, %c0_70], %60 {strides = array<i32>} : memref<72x128xf32, #tpu.memory_space<vmem>>, vector<72x128xf32>,
    %c0_71 = arith.constant 0 : index
    %c10 = arith.constant 10 : index
    %c0_72 = arith.constant 0 : index
    %62 = vector.load %arg1[%c0_71, %c10, %c0_72] : memref<1x352x128xbf16, #tpu.memory_space<vmem>>, vector<1x72x128xbf16>
    %63 = vector.shape_cast %62 : vector<1x72x128xbf16> to vector<72x128xbf16>
    %c8 = arith.constant 8 : index
    %c0_73 = arith.constant 0 : index
    %c0_74 = arith.constant 0 : index
    %64 = vector.load %arg2[%c8, %c0_73, %c0_74] : memref<9x128x128xbf16, #tpu.memory_space<vmem>>, vector<1x128x128xbf16>
    %65 = vector.shape_cast %64 : vector<1x128x128xbf16> to vector<128x128xbf16>
    %cst_75 = arith.constant dense<0.000000e+00> : vector<72x128xf32>
    %66 = tpu.matmul %63, %65, %cst_75 {dimension_numbers = #tpu.dot_dimension_numbers<[1], [0], [0], [1], [0, 0, 1, 1], [], []>} : vector<72x128xbf16>, vector<128x128xbf16>, vector<72x128xf32> -> vector<72x128xf32>
    %c0_76 = arith.constant 0 : index
    %c0_77 = arith.constant 0 : index
    %67 = vector.load %arg5[%c0_76, %c0_77] : memref<72x128xf32, #tpu.memory_space<vmem>>, vector<72x128xf32>
    %68 = arith.addf %67, %66 : vector<72x128xf32>
    %c0_78 = arith.constant 0 : index
    %c0_79 = arith.constant 0 : index
    %69 = vector.load %arg5[%c0_78, %c0_79] : memref<72x128xf32, #tpu.memory_space<vmem>>, vector<72x128xf32>
    tpu.vector_store %arg5[%c0_78, %c0_79], %68 {strides = array<i32>} : memref<72x128xf32, #tpu.memory_space<vmem>>, vector<72x128xf32>,
    %c0_80 = arith.constant 0 : index
    %c0_81 = arith.constant 0 : index
    %70 = vector.load %arg5[%c0_80, %c0_81] : memref<72x128xf32, #tpu.memory_space<vmem>>, vector<72x128xf32>
    %71 = arith.truncf %70 : vector<72x128xf32> to vector<72x128xbf16>
    %c0_82 = arith.constant 0 : index
    %c0_83 = arith.constant 0 : index
    %c0_84 = arith.constant 0 : index
    %72 = vector.load %arg3[%c0_82, %c0_83, %c0_84] : memref<1x72x128xbf16, #tpu.memory_space<vmem>>, vector<1x72x128xbf16>
    %73 = vector.shape_cast %72 : vector<1x72x128xbf16> to vector<72x128xbf16>
    %74 = vector.shape_cast %71 : vector<72x128xbf16> to vector<1x72x128xbf16>
    tpu.vector_store %arg3[%c0_82, %c0_83, %c0_84], %74 {strides = array<i32>} : memref<1x72x128xbf16, #tpu.memory_space<vmem>>, vector<1x72x128xbf16>,
    %75 = tpu.iota {dimensions = array<i32: 0>} : vector<72x1xi32>
    %c9_i32 = arith.constant 9 : i32
    %c0_i32 = arith.constant 0 : i32
    %76 = arith.cmpi eq, %c9_i32, %c0_i32 : i32
    %c1_i32 = arith.constant 1 : i32
    %77 = arith.select %76, %c1_i32, %c9_i32 : i32
    %78 = vector.broadcast %77 : i32 to vector<72x1xi32>
    %79 = arith.remsi %75, %78 : vector<72x1xi32>
    %c0_i32_85 = arith.constant 0 : i32
    %80 = vector.broadcast %c0_i32_85 : i32 to vector<72x1xi32>
    %81 = arith.cmpi ne, %79, %80 : vector<72x1xi32>
    %c0_i32_86 = arith.constant 0 : i32
    %82 = vector.broadcast %c0_i32_86 : i32 to vector<72x1xi32>
    %83 = arith.cmpi slt, %79, %82 : vector<72x1xi32>
    %c0_i32_87 = arith.constant 0 : i32
    %84 = arith.cmpi slt, %77, %c0_i32_87 : i32
    %85 = vector.broadcast %84 : i1 to vector<72x1xi1>
    %86 = vector.broadcast %85 : vector<72x1xi1> to vector<72x1xi1>
    %87 = arith.xori %83, %86 : vector<72x1xi1>
    %88 = arith.andi %87, %81 : vector<72x1xi1>
    %89 = vector.broadcast %77 : i32 to vector<72x1xi32>
    %90 = arith.addi %79, %89 : vector<72x1xi32>
    %91 = arith.select %88, %90, %79 : vector<72x1xi1>, vector<72x1xi32>
    %c8_i32 = arith.constant 8 : i32
    %92 = vector.broadcast %c8_i32 : i32 to vector<72x1xi32>
    %93 = arith.cmpi slt, %91, %92 : vector<72x1xi32>
    %c72_i32 = arith.constant 72 : i32
    %94 = vector.broadcast %c72_i32 : i32 to vector<72x1xi32>
    %95 = arith.cmpi slt, %75, %94 : vector<72x1xi32>
    %96 = arith.andi %93, %95 : vector<72x1xi1>
    %cst_88 = arith.constant 0.000000e+00 : f32
    %97 = vector.shape_cast %96 : vector<72x1xi1> to vector<72x1xi1>
    %98 = vector.broadcast %97 : vector<72x1xi1> to vector<72x128xi1>
    %99 = vector.broadcast %cst_88 : f32 to vector<72x128xf32>
    %100 = arith.select %98, %70, %99 : vector<72x128xi1>, vector<72x128xf32>
    %cst_89 = arith.constant dense<0.000000e+00> : vector<128xf32>
    %101 = vector.multi_reduction <add>, %100, %cst_89 [0] : vector<72x128xf32> to vector<128xf32>
    %102 = vector.shape_cast %101 : vector<128xf32> to vector<1x128xf32>
    %c0_90 = arith.constant 0 : index
    %c0_91 = arith.constant 0 : index
    %c0_92 = arith.constant 0 : index
    %103 = vector.load %arg4[%c0_90, %c0_91, %c0_92] : memref<1x2x128xf32, #tpu.memory_space<vmem>>, vector<1x1x128xf32>
    %104 = vector.shape_cast %103 : vector<1x1x128xf32> to vector<1x128xf32>
    %105 = vector.shape_cast %102 : vector<1x128xf32> to vector<1x1x128xf32>
    tpu.vector_store %arg4[%c0_90, %c0_91, %c0_92], %105 {strides = array<i32>} : memref<1x2x128xf32, #tpu.memory_space<vmem>>, vector<1x1x128xf32>,
    %106 = arith.mulf %100, %100 : vector<72x128xf32>
    %cst_93 = arith.constant dense<0.000000e+00> : vector<128xf32>
    %107 = vector.multi_reduction <add>, %106, %cst_93 [0] : vector<72x128xf32> to vector<128xf32>
    %108 = vector.shape_cast %107 : vector<128xf32> to vector<1x128xf32>
    %c0_94 = arith.constant 0 : index
    %c1_95 = arith.constant 1 : index
    %c0_96 = arith.constant 0 : index
    %109 = vector.load %arg4[%c0_94, %c1_95, %c0_96] : memref<1x2x128xf32, #tpu.memory_space<vmem>>, vector<1x1x128xf32>
    %110 = vector.shape_cast %109 : vector<1x1x128xf32> to vector<1x128xf32>
    %111 = vector.shape_cast %108 : vector<1x128xf32> to vector<1x1x128xf32>
    tpu.vector_store %arg4[%c0_94, %c1_95, %c0_96], %111 {strides = array<i32>} : memref<1x2x128xf32, #tpu.memory_space<vmem>>, vector<1x1x128xf32>,
    return
  }
  func.func @transform_0(%arg0: i32) -> (i32, i32, i32) {
    %c0_i32 = arith.constant 0 : i32
    %c0_i32_0 = arith.constant 0 : i32
    %c0_i32_1 = arith.constant 0 : i32
    return %arg0, %c0_i32, %c0_i32_0 : i32, i32, i32
  }
  func.func @transform_1(%arg0: i32) -> (i32, i32, i32) {
    %c0_i32 = arith.constant 0 : i32
    %c0_i32_0 = arith.constant 0 : i32
    %c0_i32_1 = arith.constant 0 : i32
    %c0_i32_2 = arith.constant 0 : i32
    return %c0_i32, %c0_i32_0, %c0_i32_1 : i32, i32, i32
  }
  func.func @transform_2(%arg0: i32) -> (i32, i32, i32) {
    %c0_i32 = arith.constant 0 : i32
    %c0_i32_0 = arith.constant 0 : i32
    %c0_i32_1 = arith.constant 0 : i32
    return %arg0, %c0_i32, %c0_i32_0 : i32, i32, i32
  }
  func.func @transform_3(%arg0: i32) -> (i32, i32, i32) {
    %c0_i32 = arith.constant 0 : i32
    %c0_i32_0 = arith.constant 0 : i32
    %c0_i32_1 = arith.constant 0 : i32
    return %arg0, %c0_i32, %c0_i32_0 : i32, i32, i32
  }
}

module attributes {stable_mosaic.version = 11 : i64} {
  func.func @_conv_stats_kernel(%arg0: i32, %arg1: memref<1x128x128xbf16, #tpu.memory_space<vmem>>, %arg2: memref<9x128x128xbf16, #tpu.memory_space<vmem>>, %arg3: memref<1x24x128xbf16, #tpu.memory_space<vmem>>, %arg4: memref<1x2x128xf32, #tpu.memory_space<vmem>>, %arg5: memref<24x128xf32, #tpu.memory_space<vmem>>) attributes {dimension_semantics = [#tpu.dimension_semantics<parallel>], iteration_bounds = array<i64: 2>, scalar_prefetch = 0 : i64, scratch_operands = 1 : i64, tpu.core_type = #tpu.core_type<tc>, window_params = [{transform_indices = @transform_0, window_bounds = array<i64: 1, 128, 128>}, {pipeline_mode = #tpu.pipeline_mode<synchronous>, transform_indices = @transform_1, window_bounds = array<i64: 9, 128, 128>}, {transform_indices = @transform_2, window_bounds = array<i64: 1, 24, 128>}, {transform_indices = @transform_3, window_bounds = array<i64: 1, 2, 128>}]} {
    %c0 = arith.constant 0 : index
    %c0_0 = arith.constant 0 : index
    %c0_1 = arith.constant 0 : index
    %0 = vector.load %arg1[%c0, %c0_0, %c0_1] : memref<1x128x128xbf16, #tpu.memory_space<vmem>>, vector<1x24x128xbf16>
    %1 = vector.shape_cast %0 : vector<1x24x128xbf16> to vector<24x128xbf16>
    %c0_2 = arith.constant 0 : index
    %c0_3 = arith.constant 0 : index
    %c0_4 = arith.constant 0 : index
    %2 = vector.load %arg2[%c0_2, %c0_3, %c0_4] : memref<9x128x128xbf16, #tpu.memory_space<vmem>>, vector<1x128x128xbf16>
    %3 = vector.shape_cast %2 : vector<1x128x128xbf16> to vector<128x128xbf16>
    %cst = arith.constant dense<0.000000e+00> : vector<24x128xf32>
    %4 = tpu.matmul %1, %3, %cst {dimension_numbers = #tpu.dot_dimension_numbers<[1], [0], [0], [1], [0, 0, 1, 1], [], []>} : vector<24x128xbf16>, vector<128x128xbf16>, vector<24x128xf32> -> vector<24x128xf32>
    %c0_5 = arith.constant 0 : index
    %c0_6 = arith.constant 0 : index
    %5 = vector.load %arg5[%c0_5, %c0_6] : memref<24x128xf32, #tpu.memory_space<vmem>>, vector<24x128xf32>
    tpu.vector_store %arg5[%c0_5, %c0_6], %4 {strides = array<i32>} : memref<24x128xf32, #tpu.memory_space<vmem>>, vector<24x128xf32>,
    %c0_7 = arith.constant 0 : index
    %c32 = arith.constant 32 : index
    %c0_8 = arith.constant 0 : index
    %6 = vector.load %arg1[%c0_7, %c32, %c0_8] : memref<1x128x128xbf16, #tpu.memory_space<vmem>>, vector<1x24x128xbf16>
    %7 = vector.shape_cast %6 : vector<1x24x128xbf16> to vector<24x128xbf16>
    %c1 = arith.constant 1 : index
    %c0_9 = arith.constant 0 : index
    %c0_10 = arith.constant 0 : index
    %8 = vector.load %arg2[%c1, %c0_9, %c0_10] : memref<9x128x128xbf16, #tpu.memory_space<vmem>>, vector<1x128x128xbf16>
    %9 = vector.shape_cast %8 : vector<1x128x128xbf16> to vector<128x128xbf16>
    %cst_11 = arith.constant dense<0.000000e+00> : vector<24x128xf32>
    %10 = tpu.matmul %7, %9, %cst_11 {dimension_numbers = #tpu.dot_dimension_numbers<[1], [0], [0], [1], [0, 0, 1, 1], [], []>} : vector<24x128xbf16>, vector<128x128xbf16>, vector<24x128xf32> -> vector<24x128xf32>
    %c0_12 = arith.constant 0 : index
    %c0_13 = arith.constant 0 : index
    %11 = vector.load %arg5[%c0_12, %c0_13] : memref<24x128xf32, #tpu.memory_space<vmem>>, vector<24x128xf32>
    %12 = arith.addf %11, %10 : vector<24x128xf32>
    %c0_14 = arith.constant 0 : index
    %c0_15 = arith.constant 0 : index
    %13 = vector.load %arg5[%c0_14, %c0_15] : memref<24x128xf32, #tpu.memory_space<vmem>>, vector<24x128xf32>
    tpu.vector_store %arg5[%c0_14, %c0_15], %12 {strides = array<i32>} : memref<24x128xf32, #tpu.memory_space<vmem>>, vector<24x128xf32>,
    %c0_16 = arith.constant 0 : index
    %c1_17 = arith.constant 1 : index
    %c0_18 = arith.constant 0 : index
    %14 = vector.load %arg1[%c0_16, %c1_17, %c0_18] : memref<1x128x128xbf16, #tpu.memory_space<vmem>>, vector<1x24x128xbf16>
    %15 = vector.shape_cast %14 : vector<1x24x128xbf16> to vector<24x128xbf16>
    %c2 = arith.constant 2 : index
    %c0_19 = arith.constant 0 : index
    %c0_20 = arith.constant 0 : index
    %16 = vector.load %arg2[%c2, %c0_19, %c0_20] : memref<9x128x128xbf16, #tpu.memory_space<vmem>>, vector<1x128x128xbf16>
    %17 = vector.shape_cast %16 : vector<1x128x128xbf16> to vector<128x128xbf16>
    %cst_21 = arith.constant dense<0.000000e+00> : vector<24x128xf32>
    %18 = tpu.matmul %15, %17, %cst_21 {dimension_numbers = #tpu.dot_dimension_numbers<[1], [0], [0], [1], [0, 0, 1, 1], [], []>} : vector<24x128xbf16>, vector<128x128xbf16>, vector<24x128xf32> -> vector<24x128xf32>
    %c0_22 = arith.constant 0 : index
    %c0_23 = arith.constant 0 : index
    %19 = vector.load %arg5[%c0_22, %c0_23] : memref<24x128xf32, #tpu.memory_space<vmem>>, vector<24x128xf32>
    %20 = arith.addf %19, %18 : vector<24x128xf32>
    %c0_24 = arith.constant 0 : index
    %c0_25 = arith.constant 0 : index
    %21 = vector.load %arg5[%c0_24, %c0_25] : memref<24x128xf32, #tpu.memory_space<vmem>>, vector<24x128xf32>
    tpu.vector_store %arg5[%c0_24, %c0_25], %20 {strides = array<i32>} : memref<24x128xf32, #tpu.memory_space<vmem>>, vector<24x128xf32>,
    %c0_26 = arith.constant 0 : index
    %c64 = arith.constant 64 : index
    %c0_27 = arith.constant 0 : index
    %22 = vector.load %arg1[%c0_26, %c64, %c0_27] : memref<1x128x128xbf16, #tpu.memory_space<vmem>>, vector<1x24x128xbf16>
    %23 = vector.shape_cast %22 : vector<1x24x128xbf16> to vector<24x128xbf16>
    %c3 = arith.constant 3 : index
    %c0_28 = arith.constant 0 : index
    %c0_29 = arith.constant 0 : index
    %24 = vector.load %arg2[%c3, %c0_28, %c0_29] : memref<9x128x128xbf16, #tpu.memory_space<vmem>>, vector<1x128x128xbf16>
    %25 = vector.shape_cast %24 : vector<1x128x128xbf16> to vector<128x128xbf16>
    %cst_30 = arith.constant dense<0.000000e+00> : vector<24x128xf32>
    %26 = tpu.matmul %23, %25, %cst_30 {dimension_numbers = #tpu.dot_dimension_numbers<[1], [0], [0], [1], [0, 0, 1, 1], [], []>} : vector<24x128xbf16>, vector<128x128xbf16>, vector<24x128xf32> -> vector<24x128xf32>
    %c0_31 = arith.constant 0 : index
    %c0_32 = arith.constant 0 : index
    %27 = vector.load %arg5[%c0_31, %c0_32] : memref<24x128xf32, #tpu.memory_space<vmem>>, vector<24x128xf32>
    %28 = arith.addf %27, %26 : vector<24x128xf32>
    %c0_33 = arith.constant 0 : index
    %c0_34 = arith.constant 0 : index
    %29 = vector.load %arg5[%c0_33, %c0_34] : memref<24x128xf32, #tpu.memory_space<vmem>>, vector<24x128xf32>
    tpu.vector_store %arg5[%c0_33, %c0_34], %28 {strides = array<i32>} : memref<24x128xf32, #tpu.memory_space<vmem>>, vector<24x128xf32>,
    %c0_35 = arith.constant 0 : index
    %c96 = arith.constant 96 : index
    %c0_36 = arith.constant 0 : index
    %30 = vector.load %arg1[%c0_35, %c96, %c0_36] : memref<1x128x128xbf16, #tpu.memory_space<vmem>>, vector<1x24x128xbf16>
    %31 = vector.shape_cast %30 : vector<1x24x128xbf16> to vector<24x128xbf16>
    %c4 = arith.constant 4 : index
    %c0_37 = arith.constant 0 : index
    %c0_38 = arith.constant 0 : index
    %32 = vector.load %arg2[%c4, %c0_37, %c0_38] : memref<9x128x128xbf16, #tpu.memory_space<vmem>>, vector<1x128x128xbf16>
    %33 = vector.shape_cast %32 : vector<1x128x128xbf16> to vector<128x128xbf16>
    %cst_39 = arith.constant dense<0.000000e+00> : vector<24x128xf32>
    %34 = tpu.matmul %31, %33, %cst_39 {dimension_numbers = #tpu.dot_dimension_numbers<[1], [0], [0], [1], [0, 0, 1, 1], [], []>} : vector<24x128xbf16>, vector<128x128xbf16>, vector<24x128xf32> -> vector<24x128xf32>
    %c0_40 = arith.constant 0 : index
    %c0_41 = arith.constant 0 : index
    %35 = vector.load %arg5[%c0_40, %c0_41] : memref<24x128xf32, #tpu.memory_space<vmem>>, vector<24x128xf32>
    %36 = arith.addf %35, %34 : vector<24x128xf32>
    %c0_42 = arith.constant 0 : index
    %c0_43 = arith.constant 0 : index
    %37 = vector.load %arg5[%c0_42, %c0_43] : memref<24x128xf32, #tpu.memory_space<vmem>>, vector<24x128xf32>
    tpu.vector_store %arg5[%c0_42, %c0_43], %36 {strides = array<i32>} : memref<24x128xf32, #tpu.memory_space<vmem>>, vector<24x128xf32>,
    %c0_44 = arith.constant 0 : index
    %c65 = arith.constant 65 : index
    %c0_45 = arith.constant 0 : index
    %38 = vector.load %arg1[%c0_44, %c65, %c0_45] : memref<1x128x128xbf16, #tpu.memory_space<vmem>>, vector<1x24x128xbf16>
    %39 = vector.shape_cast %38 : vector<1x24x128xbf16> to vector<24x128xbf16>
    %c5 = arith.constant 5 : index
    %c0_46 = arith.constant 0 : index
    %c0_47 = arith.constant 0 : index
    %40 = vector.load %arg2[%c5, %c0_46, %c0_47] : memref<9x128x128xbf16, #tpu.memory_space<vmem>>, vector<1x128x128xbf16>
    %41 = vector.shape_cast %40 : vector<1x128x128xbf16> to vector<128x128xbf16>
    %cst_48 = arith.constant dense<0.000000e+00> : vector<24x128xf32>
    %42 = tpu.matmul %39, %41, %cst_48 {dimension_numbers = #tpu.dot_dimension_numbers<[1], [0], [0], [1], [0, 0, 1, 1], [], []>} : vector<24x128xbf16>, vector<128x128xbf16>, vector<24x128xf32> -> vector<24x128xf32>
    %c0_49 = arith.constant 0 : index
    %c0_50 = arith.constant 0 : index
    %43 = vector.load %arg5[%c0_49, %c0_50] : memref<24x128xf32, #tpu.memory_space<vmem>>, vector<24x128xf32>
    %44 = arith.addf %43, %42 : vector<24x128xf32>
    %c0_51 = arith.constant 0 : index
    %c0_52 = arith.constant 0 : index
    %45 = vector.load %arg5[%c0_51, %c0_52] : memref<24x128xf32, #tpu.memory_space<vmem>>, vector<24x128xf32>
    tpu.vector_store %arg5[%c0_51, %c0_52], %44 {strides = array<i32>} : memref<24x128xf32, #tpu.memory_space<vmem>>, vector<24x128xf32>,
    %c0_53 = arith.constant 0 : index
    %c5_54 = arith.constant 5 : index
    %c0_55 = arith.constant 0 : index
    %46 = vector.load %arg1[%c0_53, %c5_54, %c0_55] : memref<1x128x128xbf16, #tpu.memory_space<vmem>>, vector<1x24x128xbf16>
    %47 = vector.shape_cast %46 : vector<1x24x128xbf16> to vector<24x128xbf16>
    %c6 = arith.constant 6 : index
    %c0_56 = arith.constant 0 : index
    %c0_57 = arith.constant 0 : index
    %48 = vector.load %arg2[%c6, %c0_56, %c0_57] : memref<9x128x128xbf16, #tpu.memory_space<vmem>>, vector<1x128x128xbf16>
    %49 = vector.shape_cast %48 : vector<1x128x128xbf16> to vector<128x128xbf16>
    %cst_58 = arith.constant dense<0.000000e+00> : vector<24x128xf32>
    %50 = tpu.matmul %47, %49, %cst_58 {dimension_numbers = #tpu.dot_dimension_numbers<[1], [0], [0], [1], [0, 0, 1, 1], [], []>} : vector<24x128xbf16>, vector<128x128xbf16>, vector<24x128xf32> -> vector<24x128xf32>
    %c0_59 = arith.constant 0 : index
    %c0_60 = arith.constant 0 : index
    %51 = vector.load %arg5[%c0_59, %c0_60] : memref<24x128xf32, #tpu.memory_space<vmem>>, vector<24x128xf32>
    %52 = arith.addf %51, %50 : vector<24x128xf32>
    %c0_61 = arith.constant 0 : index
    %c0_62 = arith.constant 0 : index
    %53 = vector.load %arg5[%c0_61, %c0_62] : memref<24x128xf32, #tpu.memory_space<vmem>>, vector<24x128xf32>
    tpu.vector_store %arg5[%c0_61, %c0_62], %52 {strides = array<i32>} : memref<24x128xf32, #tpu.memory_space<vmem>>, vector<24x128xf32>,
    %c0_63 = arith.constant 0 : index
    %c37 = arith.constant 37 : index
    %c0_64 = arith.constant 0 : index
    %54 = vector.load %arg1[%c0_63, %c37, %c0_64] : memref<1x128x128xbf16, #tpu.memory_space<vmem>>, vector<1x24x128xbf16>
    %55 = vector.shape_cast %54 : vector<1x24x128xbf16> to vector<24x128xbf16>
    %c7 = arith.constant 7 : index
    %c0_65 = arith.constant 0 : index
    %c0_66 = arith.constant 0 : index
    %56 = vector.load %arg2[%c7, %c0_65, %c0_66] : memref<9x128x128xbf16, #tpu.memory_space<vmem>>, vector<1x128x128xbf16>
    %57 = vector.shape_cast %56 : vector<1x128x128xbf16> to vector<128x128xbf16>
    %cst_67 = arith.constant dense<0.000000e+00> : vector<24x128xf32>
    %58 = tpu.matmul %55, %57, %cst_67 {dimension_numbers = #tpu.dot_dimension_numbers<[1], [0], [0], [1], [0, 0, 1, 1], [], []>} : vector<24x128xbf16>, vector<128x128xbf16>, vector<24x128xf32> -> vector<24x128xf32>
    %c0_68 = arith.constant 0 : index
    %c0_69 = arith.constant 0 : index
    %59 = vector.load %arg5[%c0_68, %c0_69] : memref<24x128xf32, #tpu.memory_space<vmem>>, vector<24x128xf32>
    %60 = arith.addf %59, %58 : vector<24x128xf32>
    %c0_70 = arith.constant 0 : index
    %c0_71 = arith.constant 0 : index
    %61 = vector.load %arg5[%c0_70, %c0_71] : memref<24x128xf32, #tpu.memory_space<vmem>>, vector<24x128xf32>
    tpu.vector_store %arg5[%c0_70, %c0_71], %60 {strides = array<i32>} : memref<24x128xf32, #tpu.memory_space<vmem>>, vector<24x128xf32>,
    %c0_72 = arith.constant 0 : index
    %c6_73 = arith.constant 6 : index
    %c0_74 = arith.constant 0 : index
    %62 = vector.load %arg1[%c0_72, %c6_73, %c0_74] : memref<1x128x128xbf16, #tpu.memory_space<vmem>>, vector<1x24x128xbf16>
    %63 = vector.shape_cast %62 : vector<1x24x128xbf16> to vector<24x128xbf16>
    %c8 = arith.constant 8 : index
    %c0_75 = arith.constant 0 : index
    %c0_76 = arith.constant 0 : index
    %64 = vector.load %arg2[%c8, %c0_75, %c0_76] : memref<9x128x128xbf16, #tpu.memory_space<vmem>>, vector<1x128x128xbf16>
    %65 = vector.shape_cast %64 : vector<1x128x128xbf16> to vector<128x128xbf16>
    %cst_77 = arith.constant dense<0.000000e+00> : vector<24x128xf32>
    %66 = tpu.matmul %63, %65, %cst_77 {dimension_numbers = #tpu.dot_dimension_numbers<[1], [0], [0], [1], [0, 0, 1, 1], [], []>} : vector<24x128xbf16>, vector<128x128xbf16>, vector<24x128xf32> -> vector<24x128xf32>
    %c0_78 = arith.constant 0 : index
    %c0_79 = arith.constant 0 : index
    %67 = vector.load %arg5[%c0_78, %c0_79] : memref<24x128xf32, #tpu.memory_space<vmem>>, vector<24x128xf32>
    %68 = arith.addf %67, %66 : vector<24x128xf32>
    %c0_80 = arith.constant 0 : index
    %c0_81 = arith.constant 0 : index
    %69 = vector.load %arg5[%c0_80, %c0_81] : memref<24x128xf32, #tpu.memory_space<vmem>>, vector<24x128xf32>
    tpu.vector_store %arg5[%c0_80, %c0_81], %68 {strides = array<i32>} : memref<24x128xf32, #tpu.memory_space<vmem>>, vector<24x128xf32>,
    %c0_82 = arith.constant 0 : index
    %c0_83 = arith.constant 0 : index
    %70 = vector.load %arg5[%c0_82, %c0_83] : memref<24x128xf32, #tpu.memory_space<vmem>>, vector<24x128xf32>
    %71 = arith.truncf %70 : vector<24x128xf32> to vector<24x128xbf16>
    %c0_84 = arith.constant 0 : index
    %c0_85 = arith.constant 0 : index
    %c0_86 = arith.constant 0 : index
    %72 = vector.load %arg3[%c0_84, %c0_85, %c0_86] : memref<1x24x128xbf16, #tpu.memory_space<vmem>>, vector<1x24x128xbf16>
    %73 = vector.shape_cast %72 : vector<1x24x128xbf16> to vector<24x128xbf16>
    %74 = vector.shape_cast %71 : vector<24x128xbf16> to vector<1x24x128xbf16>
    tpu.vector_store %arg3[%c0_84, %c0_85, %c0_86], %74 {strides = array<i32>} : memref<1x24x128xbf16, #tpu.memory_space<vmem>>, vector<1x24x128xbf16>,
    %75 = tpu.iota {dimensions = array<i32: 0>} : vector<24x1xi32>
    %c5_i32 = arith.constant 5 : i32
    %c0_i32 = arith.constant 0 : i32
    %76 = arith.cmpi eq, %c5_i32, %c0_i32 : i32
    %c1_i32 = arith.constant 1 : i32
    %77 = arith.select %76, %c1_i32, %c5_i32 : i32
    %78 = vector.broadcast %77 : i32 to vector<24x1xi32>
    %79 = arith.remsi %75, %78 : vector<24x1xi32>
    %c0_i32_87 = arith.constant 0 : i32
    %80 = vector.broadcast %c0_i32_87 : i32 to vector<24x1xi32>
    %81 = arith.cmpi ne, %79, %80 : vector<24x1xi32>
    %c0_i32_88 = arith.constant 0 : i32
    %82 = vector.broadcast %c0_i32_88 : i32 to vector<24x1xi32>
    %83 = arith.cmpi slt, %79, %82 : vector<24x1xi32>
    %c0_i32_89 = arith.constant 0 : i32
    %84 = arith.cmpi slt, %77, %c0_i32_89 : i32
    %85 = vector.broadcast %84 : i1 to vector<24x1xi1>
    %86 = vector.broadcast %85 : vector<24x1xi1> to vector<24x1xi1>
    %87 = arith.xori %83, %86 : vector<24x1xi1>
    %88 = arith.andi %87, %81 : vector<24x1xi1>
    %89 = vector.broadcast %77 : i32 to vector<24x1xi32>
    %90 = arith.addi %79, %89 : vector<24x1xi32>
    %91 = arith.select %88, %90, %79 : vector<24x1xi1>, vector<24x1xi32>
    %c4_i32 = arith.constant 4 : i32
    %92 = vector.broadcast %c4_i32 : i32 to vector<24x1xi32>
    %93 = arith.cmpi slt, %91, %92 : vector<24x1xi32>
    %c20_i32 = arith.constant 20 : i32
    %94 = vector.broadcast %c20_i32 : i32 to vector<24x1xi32>
    %95 = arith.cmpi slt, %75, %94 : vector<24x1xi32>
    %96 = arith.andi %93, %95 : vector<24x1xi1>
    %cst_90 = arith.constant 0.000000e+00 : f32
    %97 = vector.shape_cast %96 : vector<24x1xi1> to vector<24x1xi1>
    %98 = vector.broadcast %97 : vector<24x1xi1> to vector<24x128xi1>
    %99 = vector.broadcast %cst_90 : f32 to vector<24x128xf32>
    %100 = arith.select %98, %70, %99 : vector<24x128xi1>, vector<24x128xf32>
    %cst_91 = arith.constant dense<0.000000e+00> : vector<128xf32>
    %101 = vector.multi_reduction <add>, %100, %cst_91 [0] : vector<24x128xf32> to vector<128xf32>
    %102 = vector.shape_cast %101 : vector<128xf32> to vector<1x128xf32>
    %c0_92 = arith.constant 0 : index
    %c0_93 = arith.constant 0 : index
    %c0_94 = arith.constant 0 : index
    %103 = vector.load %arg4[%c0_92, %c0_93, %c0_94] : memref<1x2x128xf32, #tpu.memory_space<vmem>>, vector<1x1x128xf32>
    %104 = vector.shape_cast %103 : vector<1x1x128xf32> to vector<1x128xf32>
    %105 = vector.shape_cast %102 : vector<1x128xf32> to vector<1x1x128xf32>
    tpu.vector_store %arg4[%c0_92, %c0_93, %c0_94], %105 {strides = array<i32>} : memref<1x2x128xf32, #tpu.memory_space<vmem>>, vector<1x1x128xf32>,
    %106 = arith.mulf %100, %100 : vector<24x128xf32>
    %cst_95 = arith.constant dense<0.000000e+00> : vector<128xf32>
    %107 = vector.multi_reduction <add>, %106, %cst_95 [0] : vector<24x128xf32> to vector<128xf32>
    %108 = vector.shape_cast %107 : vector<128xf32> to vector<1x128xf32>
    %c0_96 = arith.constant 0 : index
    %c1_97 = arith.constant 1 : index
    %c0_98 = arith.constant 0 : index
    %109 = vector.load %arg4[%c0_96, %c1_97, %c0_98] : memref<1x2x128xf32, #tpu.memory_space<vmem>>, vector<1x1x128xf32>
    %110 = vector.shape_cast %109 : vector<1x1x128xf32> to vector<1x128xf32>
    %111 = vector.shape_cast %108 : vector<1x128xf32> to vector<1x1x128xf32>
    tpu.vector_store %arg4[%c0_96, %c1_97, %c0_98], %111 {strides = array<i32>} : memref<1x2x128xf32, #tpu.memory_space<vmem>>, vector<1x1x128xf32>,
    return
  }
  func.func @transform_0(%arg0: i32) -> (i32, i32, i32) {
    %c0_i32 = arith.constant 0 : i32
    %c0_i32_0 = arith.constant 0 : i32
    %c0_i32_1 = arith.constant 0 : i32
    return %arg0, %c0_i32, %c0_i32_0 : i32, i32, i32
  }
  func.func @transform_1(%arg0: i32) -> (i32, i32, i32) {
    %c0_i32 = arith.constant 0 : i32
    %c0_i32_0 = arith.constant 0 : i32
    %c0_i32_1 = arith.constant 0 : i32
    %c0_i32_2 = arith.constant 0 : i32
    return %c0_i32, %c0_i32_0, %c0_i32_1 : i32, i32, i32
  }
  func.func @transform_2(%arg0: i32) -> (i32, i32, i32) {
    %c0_i32 = arith.constant 0 : i32
    %c0_i32_0 = arith.constant 0 : i32
    %c0_i32_1 = arith.constant 0 : i32
    return %arg0, %c0_i32, %c0_i32_0 : i32, i32, i32
  }
  func.func @transform_3(%arg0: i32) -> (i32, i32, i32) {
    %c0_i32 = arith.constant 0 : i32
    %c0_i32_0 = arith.constant 0 : i32
    %c0_i32_1 = arith.constant 0 : i32
    return %arg0, %c0_i32, %c0_i32_0 : i32, i32, i32
  }
}

module attributes {stable_mosaic.version = 11 : i64} {
  func.func @_bn_relu_kernel(%arg0: i32, %arg1: memref<1x24x128xbf16, #tpu.memory_space<vmem>>, %arg2: memref<1x1x128xf32, #tpu.memory_space<vmem>>, %arg3: memref<1x1x128xf32, #tpu.memory_space<vmem>>, %arg4: memref<1x24x128xf32, #tpu.memory_space<vmem>>) attributes {dimension_semantics = [#tpu.dimension_semantics<parallel>], iteration_bounds = array<i64: 2>, scalar_prefetch = 0 : i64, scratch_operands = 0 : i64, tpu.core_type = #tpu.core_type<tc>, window_params = [{transform_indices = @transform_0, window_bounds = array<i64: 1, 24, 128>}, {pipeline_mode = #tpu.pipeline_mode<synchronous>, transform_indices = @transform_1, window_bounds = array<i64: 1, 1, 128>}, {pipeline_mode = #tpu.pipeline_mode<synchronous>, transform_indices = @transform_2, window_bounds = array<i64: 1, 1, 128>}, {transform_indices = @transform_3, window_bounds = array<i64: 1, 24, 128>}]} {
    %c0 = arith.constant 0 : index
    %c0_0 = arith.constant 0 : index
    %c0_1 = arith.constant 0 : index
    %0 = vector.load %arg1[%c0, %c0_0, %c0_1] : memref<1x24x128xbf16, #tpu.memory_space<vmem>>, vector<1x24x128xbf16>
    %1 = arith.extf %0 : vector<1x24x128xbf16> to vector<1x24x128xf32>
    %c0_2 = arith.constant 0 : index
    %c0_3 = arith.constant 0 : index
    %c0_4 = arith.constant 0 : index
    %2 = vector.load %arg2[%c0_2, %c0_3, %c0_4] : memref<1x1x128xf32, #tpu.memory_space<vmem>>, vector<1x1x128xf32>
    %3 = vector.broadcast %2 : vector<1x1x128xf32> to vector<1x24x128xf32>
    %4 = arith.mulf %1, %3 : vector<1x24x128xf32>
    %c0_5 = arith.constant 0 : index
    %c0_6 = arith.constant 0 : index
    %c0_7 = arith.constant 0 : index
    %5 = vector.load %arg3[%c0_5, %c0_6, %c0_7] : memref<1x1x128xf32, #tpu.memory_space<vmem>>, vector<1x1x128xf32>
    %6 = vector.broadcast %5 : vector<1x1x128xf32> to vector<1x24x128xf32>
    %7 = arith.addf %4, %6 : vector<1x24x128xf32>
    %cst = arith.constant 0.000000e+00 : f32
    %8 = vector.broadcast %cst : f32 to vector<1x24x128xf32>
    %9 = arith.maximumf %7, %8 : vector<1x24x128xf32>
    %c0_8 = arith.constant 0 : index
    %c0_9 = arith.constant 0 : index
    %c0_10 = arith.constant 0 : index
    %10 = vector.load %arg4[%c0_8, %c0_9, %c0_10] : memref<1x24x128xf32, #tpu.memory_space<vmem>>, vector<1x24x128xf32>
    tpu.vector_store %arg4[%c0_8, %c0_9, %c0_10], %9 {strides = array<i32>} : memref<1x24x128xf32, #tpu.memory_space<vmem>>, vector<1x24x128xf32>,
    return
  }
  func.func @transform_0(%arg0: i32) -> (i32, i32, i32) {
    %c0_i32 = arith.constant 0 : i32
    %c0_i32_0 = arith.constant 0 : i32
    %c0_i32_1 = arith.constant 0 : i32
    return %arg0, %c0_i32, %c0_i32_0 : i32, i32, i32
  }
  func.func @transform_1(%arg0: i32) -> (i32, i32, i32) {
    %c0_i32 = arith.constant 0 : i32
    %c0_i32_0 = arith.constant 0 : i32
    %c0_i32_1 = arith.constant 0 : i32
    %c0_i32_2 = arith.constant 0 : i32
    return %c0_i32, %c0_i32_0, %c0_i32_1 : i32, i32, i32
  }
  func.func @transform_2(%arg0: i32) -> (i32, i32, i32) {
    %c0_i32 = arith.constant 0 : i32
    %c0_i32_0 = arith.constant 0 : i32
    %c0_i32_1 = arith.constant 0 : i32
    %c0_i32_2 = arith.constant 0 : i32
    return %c0_i32, %c0_i32_0, %c0_i32_1 : i32, i32, i32
  }
  func.func @transform_3(%arg0: i32) -> (i32, i32, i32) {
    %c0_i32 = arith.constant 0 : i32
    %c0_i32_0 = arith.constant 0 : i32
    %c0_i32_1 = arith.constant 0 : i32
    return %arg0, %c0_i32, %c0_i32_0 : i32, i32, i32
  }
}

</mosaic_0001>

<bundles_post_ra>
// kernel: block_forward.5
= control target key start
LH: loop header
LB: loop body
LE: loop exit
PB: predicated region body
PF: predicated region fallthrough
CT: control target
= control target key end

     0   :  { %s439_s12 = smov 0   ;;  %s476_s0 = inlined_call_operand.vmem [shape: bf16[2,72,128], index: 0, kind: input, shape index: {}]   ;;  %s477_s1 = inlined_call_operand.vmem [shape: f32[1,1,128], index: 1, kind: input, shape index: {}]   ;;  %s478_s2 = inlined_call_operand.vmem [shape: f32[1,1,128], index: 2, kind: input, shape index: {}]   ;;  %s479_s3 = inlined_call_operand.vmem [shape: bf16[2,72,128], index: 3, kind: output, shape index: {}]  }
   0x1 LB: > { %s331_s13 = sadd.s32 4294967295, %s417_s12   ;;  %p335_p0 = scmp.ge.s32.totalorder %s417_s12, 1  ;;  %s417_s12 = sphi %s439_s12, %s13_s12  }
   0x2   : > { %p137_p1 = scmp.lt.s32.totalorder %s417_s12, 3 }
   0x4   : > { %p138_p2 = pnand %p335_p0, %p137_p1 }
   0x5   : > { %p161_p3 = scmp.lt.s32.totalorder (!%p138_p2), %s331_s13, 1  ;;  %v338_v0 = vld [vmem:[%s477_s1] ss:$0 sm:$0xff] (!%p138_p2) }
   0x6   : > { %141 = sbr.rel (%p138_p2) target bundleno = 37 (0x25), region = 32  ;;  %v339_v9 = vld [vmem:[%s478_s2] ss:$0 sm:$0xff] (!%p138_p2) }
   0xd   : > { %s481_s13 = smov (!%p161_p3, %s331_s13), 1 }
   0xe   : > { %s402_s14 = smul.u32 36, %s481_s13 }
  0x10   : > { %s455_s17 = scalar_lea.vmem %s476_s0, %s402_s14  ;;  %s170_s24 = scalar_lea.vmem %s479_s3, %s402_s14 }
  0x11   : > { %v361_v1 = vld [vmem:[%s455_s17] sm:$0xff]   ;;  %v396_v2 = vld [vmem:[%s455_s17 + $0x8] sm:$0xff]   ;;  %v397_v3 = vld [vmem:[%s455_s17 + $0x10] sm:$0xff]  }
  0x12   : > { %v362_v4 = vunpack.c.l.bf16 %v361_v1  ;;  %v363_v5 = vunpack.c.h.bf16 %v361_v1  ;;  %v366_v6 = vunpack.c.l.bf16 %v396_v2  ;;  %v367_v7 = vunpack.c.h.bf16 %v396_v2  ;;  %v398_v8 = vld [vmem:[%s455_s17 + $0x18] sm:$0xff]   ;;  %v179_v30 = vld [vmem:[%s455_s17 + $0x20] sm:$0xf] }
  0x13   : > { %v370_v10 = vunpack.c.l.bf16 %v397_v3  ;;  %v371_v11 = vunpack.c.h.bf16 %v397_v3  ;;  %v374_v12 = vunpack.c.l.bf16 %v398_v8  ;;  %v375_v13 = vunpack.c.h.bf16 %v398_v8 }
  0x14   : > { %v196_v14 = vmul.f32 %v362_v4, %v338_v0  ;;  %v197_v15 = vmul.f32 %v363_v5, %v338_v0  ;;  %v198_v16 = vmul.f32 %v366_v6, %v338_v0  ;;  %v199_v17 = vmul.f32 %v367_v7, %v338_v0 }
  0x15   : > { %v200_v18 = vmul.f32 %v370_v10, %v338_v0  ;;  %v201_v19 = vmul.f32 %v371_v11, %v338_v0  ;;  %v202_v20 = vmul.f32 %v374_v12, %v338_v0  ;;  %v203_v21 = vmul.f32 %v375_v13, %v338_v0 }
  0x16   : > { %v212_v22 = vadd.f32 %v339_v9, %v196_v14  ;;  %v213_v23 = vadd.f32 %v339_v9, %v197_v15  ;;  %v214_v24 = vadd.f32 %v339_v9, %v198_v16  ;;  %v215_v25 = vadd.f32 %v339_v9, %v199_v17 }
  0x17   : > { %v216_v26 = vadd.f32 %v339_v9, %v200_v18  ;;  %v217_v27 = vadd.f32 %v339_v9, %v201_v19  ;;  %v218_v28 = vadd.f32 %v339_v9, %v202_v20  ;;  %v219_v29 = vadd.f32 %v339_v9, %v203_v21 }
  0x18   : > { %v221_v31 = vmax.f32 %v212_v22, 0.0  ;;  %v222_v32 = vmax.f32 %v213_v23, 0.0  ;;  %v223_v33 = vmax.f32 %v214_v24, 0.0  ;;  %v224_v34 = vmax.f32 %v215_v25, 0.0 }
  0x19   : > { %v225_v35 = vmax.f32 %v216_v26, 0.0  ;;  %v226_v36 = vmax.f32 %v217_v27, 0.0  ;;  %v227_v37 = vmax.f32 %v218_v28, 0.0  ;;  %v228_v38 = vmax.f32 %v219_v29, 0.0 }
  0x1a   : > { %v379_v39 = vpack.c.bf16 %v222_v32, %v221_v31  ;;  %v384_v40 = vpack.c.bf16 %v224_v34, %v223_v33  ;;  %v188_v41 = vunpack.c.l.bf16 %v179_v30 }
  0x1b   : > { %v389_v42 = vpack.c.bf16 %v226_v36, %v225_v35  ;;  %v394_v43 = vpack.c.bf16 %v228_v38, %v227_v37 }
  0x1c   : > { %380 = vst [vmem:[%s170_s24] sm:$0xff] %v379_v39   ;;  %399 = vst [vmem:[%s170_s24 + $0x8] sm:$0xff] %v384_v40   ;;  %v204_v44 = vmul.f32 %v338_v0, %v188_v41 }
  0x1d   : > { %400 = vst [vmem:[%s170_s24 + $0x10] sm:$0xff] %v389_v42   ;;  %401 = vst [vmem:[%s170_s24 + $0x18] sm:$0xff] %v394_v43  }
  0x1e   : > { %v220_v45 = vadd.f32 %v339_v9, %v204_v44 }
  0x20   : > { %v229_v46 = vmax.f32 %v220_v45, 0.0 }
  0x22   : > { %v359_v47 = vpack.c.bf16 %v229_v46, %v229_v46 }
  0x24   : > { %275 = vst [vmem:[%s170_s24 + $0x20] sm:$0xf] %v359_v47 }
  0x25 PF: > { %s13_s12 = sadd.s32 1, %s417_s12  }
  0x26   : > { %p10_p4 = scmp.ge.s32.totalorder %s13_s12, 4  }
  0x28   :  { %12 = sbr.rel (!%p10_p4) target bundleno = 1 (0x1), region = 62 }

// kernel: block_forward.7
= control target key start
LH: loop header
LB: loop body
LE: loop exit
PB: predicated region body
PF: predicated region fallthrough
CT: control target
= control target key end

     0   :  { %s311_s12 = smov 0   ;;  %s334_s0 = inlined_call_operand.vmem [shape: bf16[2,24,128], index: 0, kind: input, shape index: {}]   ;;  %s335_s1 = inlined_call_operand.vmem [shape: f32[1,1,128], index: 1, kind: input, shape index: {}]   ;;  %s336_s2 = inlined_call_operand.vmem [shape: f32[1,1,128], index: 2, kind: input, shape index: {}]   ;;  %s337_s3 = inlined_call_operand.vmem [shape: f32[2,24,128], index: 3, kind: output, shape index: {}]  }
   0x1 LB: > { %s258_s13 = sadd.s32 4294967295, %s289_s12   ;;  %p262_p0 = scmp.ge.s32.totalorder %s289_s12, 1  ;;  %s289_s12 = sphi %s311_s12, %s13_s12  }
   0x2   : > { %p137_p1 = scmp.lt.s32.totalorder %s289_s12, 3 }
   0x4   : > { %p138_p2 = pnand %p262_p0, %p137_p1 }
   0x5   : > { %p161_p3 = scmp.lt.s32.totalorder (!%p138_p2), %s258_s13, 1  ;;  %v265_v1 = vld [vmem:[%s335_s1] ss:$0 sm:$0xff] (!%p138_p2) }
   0x6   : > { %141 = sbr.rel (%p138_p2) target bundleno = 28 (0x1c), region = 32  ;;  %v266_v6 = vld [vmem:[%s336_s2] ss:$0 sm:$0xff] (!%p138_p2) }
   0xd   : > { %s339_s13 = smov (!%p161_p3, %s258_s13), 1 }
   0xe   : > { %s273_s14 = smul.u32 12, %s339_s13 }
   0xf   : > { %s274_s20 = smul.u32 24, %s339_s13 }
  0x10   : > { %s165_s17 = scalar_lea.vmem %s334_s0, %s273_s14 }
  0x11   : > { %v270_v0 = vld [vmem:[%s165_s17] sm:$0xff]   ;;  %v173_v2 = vld [vmem:[%s165_s17 + $0x8] sm:$0xf]  ;;  %s170_s25 = scalar_lea.vmem %s337_s3, %s274_s20 }
  0x12   : > { %v271_v3 = vunpack.c.l.bf16 %v270_v0  ;;  %v272_v4 = vunpack.c.h.bf16 %v270_v0  ;;  %v176_v5 = vunpack.c.l.bf16 %v173_v2 }
  0x14   : > { %v184_v7 = vmul.f32 %v271_v3, %v265_v1  ;;  %v185_v8 = vmul.f32 %v272_v4, %v265_v1  ;;  %v186_v9 = vmul.f32 %v265_v1, %v176_v5 }
  0x16   : > { %v194_v10 = vadd.f32 %v266_v6, %v184_v7  ;;  %v195_v11 = vadd.f32 %v266_v6, %v185_v8  ;;  %v196_v12 = vadd.f32 %v266_v6, %v186_v9 }
  0x18   : > { %v197_v13 = vmax.f32 %v194_v10, 0.0  ;;  %v198_v14 = vmax.f32 %v195_v11, 0.0  ;;  %v199_v15 = vmax.f32 %v196_v12, 0.0 }
  0x1a   : > { %200 = vst [vmem:[%s170_s25] sm:$0xff] %v197_v13  ;;  %201 = vst [vmem:[%s170_s25 + $0x8] sm:$0xff] %v198_v14 }
  0x1b   : > { %202 = vst [vmem:[%s170_s25 + $0x10] sm:$0xff] %v199_v15 }
  0x1c PF: > { %s13_s12 = sadd.s32 1, %s289_s12  }
  0x1d   : > { %p10_p4 = scmp.ge.s32.totalorder %s13_s12, 4  }
  0x1f   :  { %12 = sbr.rel (!%p10_p4) target bundleno = 1 (0x1), region = 62 }

// kernel: block_forward.4
= control target key start
LH: loop header
LB: loop body
LE: loop exit
PB: predicated region body
PF: predicated region fallthrough
CT: control target
= control target key end

     0   :  { %s3617_s12 = smov 0   ;;  %s4320_s0 = inlined_call_operand.vmem [shape: bf16[2,352,128], index: 0, kind: input, shape index: {}]   ;;  %s4321_s1 = inlined_call_operand.vmem [shape: bf16[9,128,128], index: 1, kind: input, shape index: {}]   ;;  %s4322_s2 = inlined_call_operand.vmem [shape: bf16[2,72,128], index: 2, kind: output, shape index: {0}]   ;;  %s4323_s3 = inlined_call_operand.vmem [shape: f32[2,2,128], index: 3, kind: output, shape index: {1}]  }
   0x1 LB: > { %s2543_s13 = sadd.s32 4294967295, %s3593_s12   ;;  %p2547_p0 = scmp.ge.s32.totalorder %s3593_s12, 1  ;;  %s3593_s12 = sphi %s3617_s12, %s14_s12  }
   0x2   : > { %p140_p1 = scmp.lt.s32.totalorder %s3593_s12, 3 }
   0x4   : > { %p141_p2 = pnand %p2547_p0, %p140_p1 }
   0x5   : > { %v3470_v0 = vld [vmem:[%s4321_s1] sm:$0xff] (!%p141_p2)   ;;  %v3595_v1 = vmov (!%p141_p2), 0.0   ;;  %v3472_v3 = vld [vmem:[%s4321_s1 + $0x8] sm:$0xff] (!%p141_p2)   ;;  %vm3596_vm0 = vmmov (!%p141_p2), 0   ;;  %p168_p3 = scmp.lt.s32.totalorder (!%p141_p2), %s2543_s13, 1  ;;  %v3474_v5 = vld [vmem:[%s4321_s1 + $0x10] sm:$0xff] (!%p141_p2)  }
   0x6   : > { %144 = sbr.rel (%p141_p2) target bundleno = 455 (0x1c7), region = 28  ;;  %2956 = vmatprep.subr.bf16.mxu1 (!%p141_p2), %v3595_v1  ;;  %3100 = vmatprep.subr.bf16.mxu0 (!%p141_p2), %v3595_v1  ;;  %v3471_v2 = vld [vmem:[%s4321_s1 + $0x100] sm:$0xff] (!%p141_p2)   ;;  %v3473_v4 = vld [vmem:[%s4321_s1 + $0x108] sm:$0xff] (!%p141_p2)   ;;  %v3475_v6 = vld [vmem:[%s4321_s1 + $0x110] sm:$0xff] (!%p141_p2)   ;;  %vm618_vm1 = vsmask.f32 (!%p141_p2), 7424 }
   0x7   : > { %2957 = vmatpush3.bf16.msra.mxu1 (!%p141_p2), %v3470_v0  ;;  %2972 = vmatprep.mubr.msk.bf16.mxu1 (!%p141_p2), %vm3596_vm0, %v3595_v1  ;;  %v3476_v7 = vld [vmem:[%s4321_s1 + $0x18] sm:$0xff] (!%p141_p2)   ;;  %v3478_v9 = vld [vmem:[%s4321_s1 + $0x20] sm:$0xff] (!%p141_p2)   ;;  %v3480_v11 = vld [vmem:[%s4321_s1 + $0x28] sm:$0xff] (!%p141_p2)   ;;  %vm1993_vm2 = vcmask (!%p141_p2), 1046528  }
   0x8   : > { %3101 = vmatpush3.bf16.msra.mxu0 (!%p141_p2), %v3471_v2  ;;  %2958 = vmatprep.subr.bf16.mxu1 (!%p141_p2), %v3595_v1  ;;  %v3477_v8 = vld [vmem:[%s4321_s1 + $0x118] sm:$0xff] (!%p141_p2)   ;;  %v3479_v10 = vld [vmem:[%s4321_s1 + $0x120] sm:$0xff] (!%p141_p2)   ;;  %v3481_v12 = vld [vmem:[%s4321_s1 + $0x128] sm:$0xff] (!%p141_p2)  }
   0x9   : > { %3102 = vmatprep.subr.bf16.mxu0 (!%p141_p2), %v3595_v1  ;;  %3116 = vmatprep.mubr.msk.bf16.mxu0 (!%p141_p2), %vm3596_vm0, %v3595_v1  ;;  %v3482_v13 = vld [vmem:[%s4321_s1 + $0x30] sm:$0xff] (!%p141_p2)   ;;  %v3484_v15 = vld [vmem:[%s4321_s1 + $0x38] sm:$0xff] (!%p141_p2)   ;;  %v3488_v19 = vld [vmem:[%s4321_s1 + $0x140] sm:$0xff] (!%p141_p2)  }
   0xa   : > { %v3483_v14 = vld [vmem:[%s4321_s1 + $0x130] sm:$0xff] (!%p141_p2)   ;;  %v3485_v16 = vld [vmem:[%s4321_s1 + $0x138] sm:$0xff] (!%p141_p2)   ;;  %v3492_v20 = vld [vmem:[%s4321_s1 + $0x40] sm:$0xff] (!%p141_p2)  }
   0xb   : > { %2959 = vmatpush3.bf16.msra.mxu1 (!%p141_p2), %v3472_v3  ;;  %v3489_v21 = vld [vmem:[%s4321_s1 + $0x148] sm:$0xff] (!%p141_p2)   ;;  %v3493_v25 = vld [vmem:[%s4321_s1 + $0x150] sm:$0xff] (!%p141_p2)   ;;  %v3497_v27 = vld [vmem:[%s4321_s1 + $0x158] sm:$0xff] (!%p141_p2)  }
   0xc   : > { %3103 = vmatpush3.bf16.msra.mxu0 (!%p141_p2), %v3473_v4  ;;  %2960 = vmatprep.subr.bf16.mxu1 (!%p141_p2), %v3595_v1  ;;  %v3494_v22 = vld [vmem:[%s4321_s1 + $0x48] sm:$0xff] (!%p141_p2)   ;;  %v3498_v26 = vld [vmem:[%s4321_s1 + $0x50] sm:$0xff] (!%p141_p2)   ;;  %v3499_v29 = vld [vmem:[%s4321_s1 + $0x58] sm:$0xff] (!%p141_p2)  }
   0xd   : > { %s4351_s13 = smov (!%p168_p3, %s2543_s13), 1  ;;  %3104 = vmatprep.subr.bf16.mxu0 %v3595_v1  ;;  %v3500_v31 = vld [vmem:[%s4321_s1 + $0x160] sm:$0xff]   ;;  %v3504_v34 = vld [vmem:[%s4321_s1 + $0x168] sm:$0xff]   ;;  %v3506_v37 = vld [vmem:[%s4321_s1 + $0x170] sm:$0xff]  }
   0xe   : > { %s3440_s30 = smul.u32 176, %s4351_s13  ;;  %v3503_v32 = vld [vmem:[%s4321_s1 + $0x60] sm:$0xff]   ;;  %v3505_v35 = vld [vmem:[%s4321_s1 + $0x68] sm:$0xff]   ;;  %v3509_v39 = vld [vmem:[%s4321_s1 + $0x70] sm:$0xff]   ;;  %s2550_s20 = sshll.u32 %s4351_s13, 1 }
   0xf   : > { %2961 = vmatpush3.bf16.msra.mxu1 %v3474_v5  ;;  %v3510_v42 = vld [vmem:[%s4321_s1 + $0x178] sm:$0xff]   ;;  %v3515_v53 = vld [vmem:[%s4321_s1 + $0x180] sm:$0xff]   ;;  %v3516_v59 = vld [vmem:[%s4321_s1 + $0x188] sm:$0xff]   ;;  %s181_s23 = scalar_lea.vmem %s4323_s3, %s2550_s20 }
  0x10   : > { %3105 = vmatpush3.bf16.msra.mxu0 %v3475_v6  ;;  %2962 = vmatprep.subr.bf16.mxu1 %v3595_v1  ;;  %s3674_s10 = scalar_lea.vmem %s4320_s0, %s3440_s30  ;;  %v3511_v44 = vld [vmem:[%s4321_s1 + $0x78] sm:$0xff]   ;;  %v3519_v57 = vld [vmem:[%s4321_s1 + $0x80] sm:$0xff]   ;;  %v3521_v62 = vld [vmem:[%s4321_s1 + $0x88] sm:$0xff]  }
  0x11   : > { %3106 = vmatprep.subr.bf16.mxu0 %v3595_v1  ;;  %v3486_v17 = vld [vmem:[%s3674_s10] sm:$0xff]   ;;  %v3490_v23 = vld [vmem:[%s3674_s10 + $0x8] sm:$0xff]   ;;  %v3495_v28 = vld [vmem:[%s3674_s10 + $0x10] sm:$0xff]  }
  0x12   : > { %v3487_v18 = vld [vmem:[%s3674_s10 + $0x84] sm:$0xff]   ;;  %v3491_v24 = vld [vmem:[%s3674_s10 + $0x8c] sm:$0xff]   ;;  %v3496_v30 = vld [vmem:[%s3674_s10 + $0x94] sm:$0xff]  }
  0x13   : > { %2963 = vmatpush3.bf16.msra.mxu1 %v3476_v7  ;;  %v3501_v33 = vld [vmem:[%s3674_s10 + $0x18] sm:$0xff]   ;;  %v3514_v40 = vld [vmem:[%s3674_s10 + $0x60] sm:$0xff]   ;;  %v3518_v50 = vld [vmem:[%s3674_s10 + $0x68] sm:$0xff]  }
  0x14   : > { %3107 = vmatpush3.bf16.msra.mxu0 %v3477_v8  ;;  %2964 = vmatprep.subr.bf16.mxu1 %v3595_v1  ;;  %v3502_v36 = vld [vmem:[%s3674_s10 + $0x9c] sm:$0xff]   ;;  %v3508_v45 = vld [vmem:[%s3674_s10 + $0xa4] ss:$0 sps:$4 sm:$0xff]   ;;  %v1272_v46 = vshll.u32 %v3514_v40, 16  ;;  %v3512_v52 = vld [vmem:[%s3674_s10 + $0x2c] sm:$0xff]   ;;  %v1276_v55 = vshrl.u32 %v3514_v40, 16 }
  0x15   : > { %3108 = vmatprep.subr.bf16.mxu0 %v3595_v1  ;;  %v3513_v38 = vld [vmem:[%s3674_s10 + $0x58] sm:$0xff]   ;;  %v3507_v41 = vld [vmem:[%s3674_s10 + $0x20] ss:$0 sps:$4 sm:$0xff]   ;;  %v1280_v56 = vshll.u32 %v3518_v50, 16  ;;  %v3523_v58 = vld [vmem:[%s3674_s10 + $0x70] sm:$0xff]   ;;  %v1284_v4 = vshrl.u32 %v3518_v50, 16 }
  0x16   : > { %v1267_v43 = vshll.u32 %v3513_v38, 16  ;;  %v1265_v47 = vshrl.u32 %v3513_v38, 16  ;;  %v1274_v49 = vrot.slane %v1272_v46, 1  ;;  %v3517_v63 = vld [vmem:[%s3674_s10 + $0x34] sm:$0xff]   ;;  %v1288_v0 = vshll.u32 %v3523_v58, 16 }
  0x17   : > { %2965 = vmatpush3.bf16.msra.mxu1 %v3478_v9  ;;  %v1282_v61 = vrot.slane %v1280_v56, 1  ;;  %v3520_v3 = vld [vmem:[%s4321_s1 + $0x190] sm:$0xff]   ;;  %v3524_v7 = vld [vmem:[%s4321_s1 + $0x198] sm:$0xff]   ;;  %v3543_v56 = vld [vmem:[%s4321_s1 + $0x1c8] sm:$0xff]  }
  0x18   : > { %3109 = vmatpush3.bf16.msra.mxu0 %v3479_v10  ;;  %2966 = vmatprep.subr.bf16.mxu1 %v3595_v1  ;;  %v1269_v48 = vrot.slane %v1267_v43, 1  ;;  %v1278_v60 = vor.u32 %v1276_v55, %v1274_v49  ;;  %v3525_v5 = vld [vmem:[%s4321_s1 + $0x90] sm:$0xff]   ;;  %v1290_v6 = vrot.slane %v1288_v0, 1  ;;  %v3529_v9 = vld [vmem:[%s3674_s10 + $0x78] sm:$0x1f]   ;;  %v3546_v55 = vld [vmem:[%s4321_s1 + $0xc0] sm:$0xff]  }
  0x19   : > { %3110 = vmatprep.subr.bf16.mxu0 %v3595_v1  ;;  %v1286_v8 = vor.u32 %v1284_v4, %v1282_v61  ;;  %v3526_v10 = vld [vmem:[%s4321_s1 + $0x98] sm:$0xff]   ;;  %v3544_v43 = vld [vmem:[%s3674_s10 + $0x10] sm:$0xff]  }
  0x1a   : > { %v1270_v51 = vor.u32 %v1269_v48, %v1265_v47  ;;  %v1283_v2 = vsel %vm618_vm1, %v1278_v60, %v1282_v61  ;;  %v3545_v47 = vld [vmem:[%s3674_s10 + $0x14] sm:$0xff]  }
  0x1b   : > { %2967 = vmatpush3.bf16.msra.mxu1 %v3480_v11  ;;  %v3522_v11 = vld [vmem:[%s3674_s10 + $0x3c] sm:$0xff]  }
  0x1c   : > { %3111 = vmatpush3.bf16.msra.mxu0 %v3481_v12  ;;  %2968 = vmatprep.subr.bf16.mxu1 %v3595_v1  ;;  %v1275_v54 = vsel %vm618_vm1, %v1270_v51, %v1274_v49  ;;  %v1292_v12 = vshrl.u32 %v3523_v58, 16  ;;  %v635_v49 = vshll.u32 %v3544_v43, 16 }
  0x1d   : > { %3112 = vmatprep.subr.bf16.mxu0 %v3595_v1 }
  0x1e   : > { %v637_v58 = vrot.slane %v635_v49, 1  ;;  %v3570_v49 = vld [vmem:[%s3674_s10 + $0x40] sm:$0xff]  }
  0x1f   : > { %2969 = vmatpush3.bf16.msra.mxu1 %v3482_v13  ;;  %v1291_v13 = vsel %vm618_vm1, %v1286_v8, %v1290_v6  ;;  %v3552_v8 = vld [vmem:[%s4321_s1 + $0xd0] sm:$0xff]  }
  0x20   : > { %3113 = vmatpush3.bf16.msra.mxu0 %v3483_v14  ;;  %2970 = vmatprep.subr.bf16.mxu1 %v3595_v1  ;;  %v3527_v14 = vld [vmem:[%s4321_s1 + $0x1a0] sm:$0xff]  }
  0x21   : > { %3114 = vmatprep.subr.bf16.mxu0 %v3595_v1 }
  0x23   : > { %2971 = vmatpush3.bf16.msra.mxu1 %v3484_v15  ;;  %v1296_v15 = vshll.u32 %v3529_v9, 16 }
  0x24   : > { %3115 = vmatpush3.bf16.msra.mxu0 %v3485_v16  ;;  %2992 = vmatprep.subr.bf16.mxu1 %v3595_v1  ;;  %v3530_v16 = vld [vmem:[%s4321_s1 + $0xa0] sm:$0xff]  }
  0x25   : > { %3136 = vmatprep.subr.bf16.mxu0 %v3595_v1 }
  0x26   : > { %2973 = vmatmul.mubr.bf16.vlgmr.msra.gmra.mrb[0].mxu1 %v3486_v17  ;;  %v3528_v17 = vld [vmem:[%s3674_s10 + $0x44] sm:$0xff]  }
  0x27   : > { %3117 = vmatmul.mubr.bf16.vlgmr.msra.gmra.mrb[0].mxu0 %v3487_v18  ;;  %2976 = vmatprep.mubr.msk.bf16.mxu1 %vm3596_vm0, %v3595_v1  ;;  %v1294_v18 = vor.u32 %v1292_v12, %v1290_v6  ;;  %v1527_v6 = vshrl.u32 %v3545_v47, 16 }
  0x28   : > { %3137 = vmatpush3.bf16.msra.mxu0 %v3488_v19  ;;  %3120 = vmatprep.mubr.msk.bf16.mxu0 %vm3596_vm0, %v3595_v1  ;;  %v1298_v19 = vrot.slane %v1296_v15, 1  ;;  %v3556_v15 = vld [vmem:[%s3674_s10 + $0x24] sm:$0x1f]  }
  0x29   : > { %3138 = vmatprep.subr.bf16.mxu0 %v3595_v1  ;;  %2993 = vmatpush3.bf16.msra.mxu1 %v3492_v20  ;;  %v3531_v20 = vld [vmem:[%s4321_s1 + $0x1a8] sm:$0xff]  }
  0x2a   : > { %2994 = vmatprep.subr.bf16.mxu1 %v3595_v1 }
  0x2c   : > { %3139 = vmatpush3.bf16.msra.mxu0 %v3489_v21  ;;  %v3532_v21 = vld [vmem:[%s4321_s1 + $0xa8] sm:$0xff]  }
  0x2d   : > { %3140 = vmatprep.subr.bf16.mxu0 %v3595_v1  ;;  %2995 = vmatpush3.bf16.msra.mxu1 %v3494_v22  ;;  %v3533_v22 = vld [vmem:[%s4321_s1 + $0x1b0] sm:$0xff]  }
  0x2e   : > { %2977 = vmatmul.mubr.bf16.gmra.mrb[4].mxu1 %v3490_v23  ;;  %2996 = vmatprep.subr.bf16.mxu1 %v3595_v1  ;;  %v3535_v23 = vld [vmem:[%s4321_s1 + $0xb0] sm:$0xff]  }
  0x2f   : > { %3121 = vmatmul.mubr.bf16.gmra.mrb[4].mxu0 %v3491_v24  ;;  %2980 = vmatprep.mubr.msk.bf16.mxu1 %vm3596_vm0, %v3595_v1  ;;  %v3538_v24 = vld [vmem:[%s3674_s10] sm:$0xff]  }
  0x30   : > { %3141 = vmatpush3.bf16.msra.mxu0 %v3493_v25  ;;  %3124 = vmatprep.mubr.msk.bf16.mxu0 %vm3596_vm0, %v3595_v1  ;;  %v1299_v25 = vsel %vm618_vm1, %v1294_v18, %v1298_v19 }
  0x31   : > { %3142 = vmatprep.subr.bf16.mxu0 %v3595_v1  ;;  %2997 = vmatpush3.bf16.msra.mxu1 %v3498_v26  ;;  %v3540_v26 = vld [vmem:[%s3674_s10 + $0x4] sm:$0xff]  }
  0x32   : > { %2998 = vmatprep.subr.bf16.mxu1 %v3595_v1 }
  0x34   : > { %3143 = vmatpush3.bf16.msra.mxu0 %v3497_v27  ;;  %v1300_v27 = vshrl.u32 %v3529_v9, 16 }
  0x35   : > { %3144 = vmatprep.subr.bf16.mxu0 %v3595_v1  ;;  %2999 = vmatpush3.bf16.msra.mxu1 %v3499_v29  ;;  %v3536_v29 = vld [vmem:[%s4321_s1 + $0x1b8] sm:$0xff]  }
  0x36   : > { %2981 = vmatmul.mubr.bf16.gmra.mrb[8].mxu1 %v3495_v28  ;;  %3000 = vmatprep.subr.bf16.mxu1 %v3595_v1  ;;  %v3539_v28 = vld [vmem:[%s3674_s10 + $0x8] sm:$0xff]  }
  0x37   : > { %3125 = vmatmul.mubr.bf16.gmra.mrb[8].mxu0 %v3496_v30  ;;  %2984 = vmatprep.mubr.msk.bf16.mxu1 %vm3596_vm0, %v3595_v1  ;;  %v622_v30 = vshll.u32 %v3538_v24, 16  ;;  %v631_v48 = vshrl.u32 %v3539_v28, 16 }
  0x38   : > { %3145 = vmatpush3.bf16.msra.mxu0 %v3500_v31  ;;  %3128 = vmatprep.mubr.msk.bf16.mxu0 %vm3596_vm0, %v3595_v1  ;;  %v3537_v31 = vld [vmem:[%s4321_s1 + $0xb8] sm:$0xff]  }
  0x39   : > { %3001 = vmatpush3.bf16.msra.mxu1 %v3503_v32  ;;  %3146 = vmatprep.subr.bf16.mxu0 %v3595_v1  ;;  %v3541_v32 = vld [vmem:[%s3674_s10 + $0xc] sm:$0xff]   ;;  %v624_v38 = vrot.slane %v622_v30, 1 }
  0x3a   : > { %3002 = vmatprep.subr.bf16.mxu1 %v3595_v1  ;;  %v3559_v30 = vld [vmem:[%s4321_s1 + $0xe8] sm:$0xff]  }
  0x3c   : > { %3147 = vmatpush3.bf16.msra.mxu0 %v3504_v34  ;;  %v3534_v34 = vld [vmem:[%s3674_s10 + $0x4c] ss:$0 sps:$4 sm:$0xff]  }
  0x3d   : > { %3003 = vmatpush3.bf16.msra.mxu1 %v3505_v35  ;;  %3148 = vmatprep.subr.bf16.mxu0 %v3595_v1  ;;  %v620_v35 = vshrl.u32 %v3538_v24, 16  ;;  %v3557_v24 = vld [vmem:[%s4321_s1 + $0xe0] sm:$0xff]  }
  0x3e   : > { %2985 = vmatmul.mubr.bf16.gmra.mrb[12].mxu1 %v3501_v33  ;;  %3004 = vmatprep.subr.bf16.mxu1 %v3595_v1  ;;  %v1510_v33 = vshll.u32 %v3540_v26, 16 }
  0x3f   : > { %3129 = vmatmul.mubr.bf16.gmra.mrb[12].mxu0 %v3502_v36  ;;  %2988 = vmatprep.mubr.msk.bf16.mxu1 %vm3596_vm0, %v3595_v1  ;;  %v627_v36 = vshll.u32 %v3539_v28, 16 }
  0x40   : > { %3132 = vmatprep.mubr.msk.bf16.mxu0 %vm3596_vm0, %v3595_v1  ;;  %3149 = vmatpush3.bf16.msra.mxu0 %v3506_v37  ;;  %v1302_v37 = vor.u32 %v1300_v27, %v1298_v19  ;;  %v1512_v40 = vrot.slane %v1510_v33, 1  ;;  %v3560_v33 = vld [vmem:[%s4321_s1 + $0x1f0] sm:$0xff]  }
  0x41   : > { %3005 = vmatpush3.bf16.msra.mxu1 %v3509_v39  ;;  %3150 = vmatprep.subr.bf16.mxu0 %v3595_v1  ;;  %v1508_v39 = vshrl.u32 %v3540_v26, 16 }
  0x42   : > { %3006 = vmatprep.subr.bf16.mxu1 %v3595_v1 }
  0x44   : > { %3151 = vmatpush3.bf16.msra.mxu0 %v3510_v42  ;;  %v629_v42 = vrot.slane %v627_v36, 1 }
  0x45   : > { %3007 = vmatpush3.bf16.msra.mxu1 %v3511_v44  ;;  %3172 = vmatprep.subr.bf16.mxu0 %v3595_v1  ;;  %v625_v44 = vor.u32 %v624_v38, %v620_v35  ;;  %v3561_v35 = vld [vmem:[%s4321_s1 + $0xf0] sm:$0xff]   ;;  %v3562_v38 = vld [vmem:[%s4321_s1 + $0x1f8] sm:$0xff]  }
  0x46   : > { %2989 = vmatmul.mubr.bf16.gmra.mrb[16].mxu1 %v3507_v41  ;;  %3028 = vmatprep.subr.bf16.mxu1 %v3595_v1  ;;  %v1515_v41 = vshll.u32 %v3541_v32, 16 }
  0x47   : > { %3133 = vmatmul.mubr.bf16.gmra.mrb[16].mxu0 %v3508_v45  ;;  %3008 = vmatprep.mubr.msk.bf16.mxu1 %vm3596_vm0, %v3595_v1  ;;  %v1513_v45 = vor.u32 %v1512_v40, %v1508_v39  ;;  %v630_v50 = vsel %vm618_vm1, %v625_v44, %v629_v42  ;;  %v3566_v39 = vld [vmem:[%s3674_s10 + $0x38] sm:$0xff]  }
  0x48   : > { %3152 = vmatprep.mubr.msk.bf16.mxu0 %vm3596_vm0, %v3595_v1  ;;  %v1517_v46 = vrot.slane %v1515_v41, 1  ;;  %v3563_v41 = vld [vmem:[%s4321_s1 + $0xf8] sm:$0xff]  }
  0x4a   : > { %v1518_v51 = vsel %vm618_vm1, %v1513_v45, %v1517_v46 }
  0x4e   : > { %3009 = vmatmul.mubr.bf16.vlgmr.msra.gmra.mrb[0].mxu1 %v3512_v52  ;;  %v3542_v52 = vld [vmem:[%s4321_s1 + $0x1c0] sm:$0xff]  }
  0x4f   : > { %3153 = vmatmul.mubr.bf16.vlgmr.msra.gmra.mrb[0].mxu0 %v1275_v54  ;;  %3012 = vmatprep.mubr.msk.bf16.mxu1 %vm3596_vm0, %v3595_v1  ;;  %v1523_v54 = vshll.u32 %v3545_v47, 16 }
  0x50   : > { %3173 = vmatpush3.bf16.msra.mxu0 %v3515_v53  ;;  %3156 = vmatprep.mubr.msk.bf16.mxu0 %vm3596_vm0, %v3595_v1  ;;  %v1519_v53 = vshrl.u32 %v3541_v32, 16 }
  0x51   : > { %3174 = vmatprep.subr.bf16.mxu0 %v3595_v1  ;;  %3029 = vmatpush3.bf16.msra.mxu1 %v3519_v57  ;;  %v633_v57 = vor.u32 %v631_v48, %v629_v42  ;;  %v1525_v61 = vrot.slane %v1523_v54, 1  ;;  %v1766_v54 = vshll.u32 %v3570_v49, 16 }
  0x52   : > { %3030 = vmatprep.subr.bf16.mxu1 %v3595_v1  ;;  %v1521_v60 = vor.u32 %v1519_v53, %v1517_v46  ;;  %v1758_v46 = vshll.u32 %v3566_v39, 16  ;;  %v1762_v53 = vshrl.u32 %v3566_v39, 16 }
  0x53   : > { %v638_v0 = vsel %vm618_vm1, %v633_v57, %v637_v58  ;;  %v1529_v12 = vor.u32 %v1527_v6, %v1525_v61  ;;  %v1768_v57 = vrot.slane %v1766_v54, 1 }
  0x54   : > { %3175 = vmatpush3.bf16.msra.mxu0 %v3516_v59  ;;  %v3549_v59 = vld [vmem:[%s3674_s10 + $0x18] sm:$0xff]   ;;  %v1526_v4 = vsel %vm618_vm1, %v1521_v60, %v1525_v61  ;;  %v1760_v48 = vrot.slane %v1758_v46, 1  ;;  %v3571_v61 = vld [vmem:[%s4321_s1 + $0x210] sm:$0xff]  }
  0x55   : > { %3176 = vmatprep.subr.bf16.mxu0 %v3595_v1  ;;  %3031 = vmatpush3.bf16.msra.mxu1 %v3521_v62  ;;  %v3550_v62 = vld [vmem:[%s3674_s10 + $0x1c] sm:$0xff]   ;;  %v647_v18 = vshrl.u32 %v3549_v59, 16 }
  0x56   : > { %3013 = vmatmul.mubr.bf16.gmra.mrb[4].mxu1 %v3517_v63  ;;  %3032 = vmatprep.subr.bf16.mxu1 %v3595_v1  ;;  %v3548_v63 = vld [vmem:[%s4321_s1 + $0xc8] sm:$0xff]  }
  0x57   : > { %3157 = vmatmul.mubr.bf16.gmra.mrb[4].mxu0 %v1283_v2  ;;  %3016 = vmatprep.mubr.msk.bf16.mxu1 %vm3596_vm0, %v3595_v1  ;;  %v639_v2 = vshrl.u32 %v3544_v43, 16 }
  0x58   : > { %3177 = vmatpush3.bf16.msra.mxu0 %v3520_v3  ;;  %3160 = vmatprep.mubr.msk.bf16.mxu0 %vm3596_vm0, %v3595_v1  ;;  %v643_v3 = vshll.u32 %v3549_v59, 16  ;;  %v3569_v59 = vld [vmem:[%s3674_s10 + $0x60] sm:$0xff]  }
  0x59   : > { %3178 = vmatprep.subr.bf16.mxu0 %v3595_v1  ;;  %3033 = vmatpush3.bf16.msra.mxu1 %v3525_v5  ;;  %v3547_v5 = vld [vmem:[%s4321_s1 + $0x1d0] sm:$0xff]   ;;  %v641_v9 = vor.u32 %v639_v2, %v637_v58  ;;  %v3573_v58 = vld [vmem:[%s3674_s10 + $0x48] sm:$0xff]  }
  0x5a   : > { %3034 = vmatprep.subr.bf16.mxu1 %v3595_v1 }
  0x5c   : > { %3179 = vmatpush3.bf16.msra.mxu0 %v3524_v7  ;;  %v1531_v7 = vshll.u32 %v3550_v62, 16 }
  0x5d   : > { %3180 = vmatprep.subr.bf16.mxu0 %v3595_v1  ;;  %3035 = vmatpush3.bf16.msra.mxu1 %v3526_v10  ;;  %v645_v10 = vrot.slane %v643_v3, 1  ;;  %v3574_v3 = vld [vmem:[%s4321_s1 + $0x218] sm:$0xff]  }
  0x5e   : > { %3017 = vmatmul.mubr.bf16.gmra.mrb[8].mxu1 %v3522_v11  ;;  %3036 = vmatprep.subr.bf16.mxu1 %v3595_v1  ;;  %v3555_v11 = vld [vmem:[%s3674_s10 + $0x20] sm:$0x1f]  }
  0x5f   : > { %3161 = vmatmul.mubr.bf16.gmra.mrb[8].mxu0 %v1291_v13  ;;  %3020 = vmatprep.mubr.msk.bf16.mxu1 %vm3596_vm0, %v3595_v1  ;;  %v1533_v13 = vrot.slane %v1531_v7, 1  ;;  %v651_v19 = vshll.u32 %v3555_v11, 16  ;;  %v655_v36 = vshrl.u32 %v3555_v11, 16  ;;  %v3575_v7 = vld [vmem:[%s4321_s1 + $0x220] sm:$0xff]  }
  0x60   : > { %3181 = vmatpush3.bf16.msra.mxu0 %v3527_v14  ;;  %3164 = vmatprep.mubr.msk.bf16.mxu0 %vm3596_vm0, %v3595_v1  ;;  %v3551_v14 = vld [vmem:[%s4321_s1 + $0x1d8] sm:$0xff]  }
  0x61   : > { %3037 = vmatpush3.bf16.msra.mxu1 %v3530_v16  ;;  %3182 = vmatprep.subr.bf16.mxu0 %v3595_v1  ;;  %v3553_v16 = vld [vmem:[%s4321_s1 + $0xd8] sm:$0xff]   ;;  %v653_v26 = vrot.slane %v651_v19, 1 }
  0x62   : > { %3038 = vmatprep.subr.bf16.mxu1 %v3595_v1 }
  0x63   : > { %v657_v42 = vor.u32 %v655_v36, %v653_v26 }
  0x64   : > { %3183 = vmatpush3.bf16.msra.mxu0 %v3531_v20  ;;  %v1534_v20 = vsel %vm618_vm1, %v1529_v12, %v1533_v13  ;;  %v3578_v12 = vld [vmem:[%s4321_s1 + $0x228] sm:$0xff]  }
  0x65   : > { %3039 = vmatpush3.bf16.msra.mxu1 %v3532_v21  ;;  %3184 = vmatprep.subr.bf16.mxu0 %v3595_v1  ;;  %v3554_v21 = vld [vmem:[%s4321_s1 + $0x1e0] sm:$0xff]  }
  0x66   : > { %3021 = vmatmul.mubr.bf16.gmra.mrb[12].mxu1 %v3528_v17  ;;  %3040 = vmatprep.subr.bf16.mxu1 %v3595_v1  ;;  %v646_v17 = vsel %vm618_vm1, %v641_v9, %v645_v10 }
  0x67   : > { %3165 = vmatmul.mubr.bf16.gmra.mrb[12].mxu0 %v1299_v25  ;;  %3024 = vmatprep.mubr.msk.bf16.mxu1 %vm3596_vm0, %v3595_v1  ;;  %v649_v25 = vor.u32 %v647_v18, %v645_v10  ;;  %v3580_v18 = vld [vmem:[%s3674_s10 + $0x78] ss:$0 sps:$4 sm:$0xff]  }
  0x68   : > { %3168 = vmatprep.mubr.msk.bf16.mxu0 %vm3596_vm0, %v3595_v1  ;;  %3185 = vmatpush3.bf16.msra.mxu0 %v3533_v22  ;;  %v1535_v22 = vshrl.u32 %v3550_v62, 16  ;;  %v1770_v62 = vshrl.u32 %v3570_v49, 16 }
  0x69   : > { %3041 = vmatpush3.bf16.msra.mxu1 %v3535_v23  ;;  %3186 = vmatprep.subr.bf16.mxu0 %v3595_v1  ;;  %v1539_v23 = vshll.u32 %v3556_v15, 16 }
  0x6a   : > { %3042 = vmatprep.subr.bf16.mxu1 %v3595_v1  ;;  %v1537_v27 = vor.u32 %v1535_v22, %v1533_v13  ;;  %v3576_v13 = vld [vmem:[%s3674_s10 + $0x70] sm:$0xff]   ;;  %v3582_v22 = vld [vmem:[%s3674_s10 + $0x4] sm:$0xfe]  }
  0x6b   : > { %v1541_v28 = vrot.slane %v1539_v23, 1  ;;  %v3583_v23 = vld [vmem:[%s3674_s10 + $0xc] sm:$0xff]  }
  0x6c   : > { %3187 = vmatpush3.bf16.msra.mxu0 %v3536_v29  ;;  %v3558_v29 = vld [vmem:[%s4321_s1 + $0x1e8] sm:$0xff]  }
  0x6d   : > { %3043 = vmatpush3.bf16.msra.mxu1 %v3537_v31  ;;  %3208 = vmatprep.subr.bf16.mxu0 %v3595_v1  ;;  %v654_v31 = vsel %vm618_vm1, %v649_v25, %v653_v26  ;;  %v1542_v32 = vsel %vm618_vm1, %v1537_v27, %v1541_v28  ;;  %v1994_v26 = vrot.slane %v3582_v22, 1  ;;  %v1995_v27 = vrot.slane %v3583_v23, 1 }
  0x6e   : > { %3025 = vmatmul.mubr.bf16.gmra.mrb[16].mxu1 %v3534_v34  ;;  %3064 = vmatprep.subr.bf16.mxu1 %v3595_v1  ;;  %v3565_v34 = vld [vmem:[%s3674_s10 + $0x30] sm:$0xff]  }
  0x6f   : > { %3169 = vmatmul.mubr.bf16.gmra.mrb[16].mxu0 %v1302_v37  ;;  %3044 = vmatprep.mubr.msk.bf16.mxu1 %vm3596_vm0, %v3595_v1  ;;  %v1543_v37 = vshrl.u32 %v3556_v15, 16  ;;  %v1753_v40 = vshll.u32 %v3565_v34, 16  ;;  %v1751_v44 = vshrl.u32 %v3565_v34, 16  ;;  %v3579_v15 = vld [vmem:[%s4321_s1 + $0x230] sm:$0xff]  }
  0x70   : > { %3188 = vmatprep.mubr.msk.bf16.mxu0 %vm3596_vm0, %v3595_v1 }
  0x71   : > { %v1545_v43 = vor.u32 %v1543_v37, %v1541_v28  ;;  %v1755_v45 = vrot.slane %v1753_v40, 1 }
  0x73   : > { %v1756_v47 = vor.u32 %v1755_v45, %v1751_v44 }
  0x76   : > { %3045 = vmatmul.mubr.bf16.vlgmr.msra.gmra.mrb[0].mxu1 %v630_v50  ;;  %v3564_v50 = vld [vmem:[%s3674_s10 + $0x58] sm:$0xff]  }
  0x77   : > { %3189 = vmatmul.mubr.bf16.vlgmr.msra.gmra.mrb[0].mxu0 %v1518_v51  ;;  %3048 = vmatprep.mubr.msk.bf16.mxu1 %vm3596_vm0, %v3595_v1  ;;  %v1761_v51 = vsel %vm618_vm1, %v1756_v47, %v1760_v48 }
  0x78   : > { %3209 = vmatpush3.bf16.msra.mxu0 %v3542_v52  ;;  %3192 = vmatprep.mubr.msk.bf16.mxu0 %vm3596_vm0, %v3595_v1  ;;  %v3567_v52 = vld [vmem:[%s4321_s1 + $0x200] sm:$0xff]  }
  0x79   : > { %3210 = vmatprep.subr.bf16.mxu0 %v3595_v1  ;;  %3065 = vmatpush3.bf16.msra.mxu1 %v3546_v55  ;;  %v3568_v55 = vld [vmem:[%s4321_s1 + $0x208] sm:$0xff]  }
  0x7a   : > { %3066 = vmatprep.subr.bf16.mxu1 %v3595_v1 }
  0x7c   : > { %3211 = vmatpush3.bf16.msra.mxu0 %v3543_v56  ;;  %v1764_v56 = vor.u32 %v1762_v53, %v1760_v48 }
  0x7d   : > { %3212 = vmatprep.subr.bf16.mxu0 %v3595_v1  ;;  %3067 = vmatpush3.bf16.msra.mxu1 %v3548_v63  ;;  %v1774_v63 = vshll.u32 %v3573_v58, 16 }
  0x7e   : > { %3049 = vmatmul.mubr.bf16.gmra.mrb[4].mxu1 %v638_v0  ;;  %3068 = vmatprep.subr.bf16.mxu1 %v3595_v1  ;;  %v1769_v60 = vsel %vm618_vm1, %v1764_v56, %v1768_v57  ;;  %v1772_v0 = vor.u32 %v1770_v62, %v1768_v57 }
  0x7f   : > { %3193 = vmatmul.mubr.bf16.gmra.mrb[4].mxu0 %v1526_v4  ;;  %3052 = vmatprep.mubr.msk.bf16.mxu1 %vm3596_vm0, %v3595_v1  ;;  %v1776_v2 = vrot.slane %v1774_v63, 1  ;;  %v3577_v4 = vld [vmem:[%s3674_s10 + $0x50] sm:$0x1f]  }
  0x80   : > { %3213 = vmatpush3.bf16.msra.mxu0 %v3547_v5  ;;  %3196 = vmatprep.mubr.msk.bf16.mxu0 %vm3596_vm0, %v3595_v1  ;;  %v3572_v5 = vld [vmem:[%s3674_s10 + $0x68] sm:$0xff]   ;;  %v1782_v9 = vshll.u32 %v3577_v4, 16 }
  0x81   : > { %3214 = vmatprep.subr.bf16.mxu0 %v3595_v1  ;;  %3069 = vmatpush3.bf16.msra.mxu1 %v3552_v8  ;;  %v1777_v6 = vsel %vm618_vm1, %v1772_v0, %v1776_v2  ;;  %v1778_v8 = vshrl.u32 %v3573_v58, 16 }
  0x82   : > { %3070 = vmatprep.subr.bf16.mxu1 %v3595_v1  ;;  %v1784_v11 = vrot.slane %v1782_v9, 1 }
  0x83   : > { %v1780_v10 = vor.u32 %v1778_v8, %v1776_v2 }
  0x84   : > { %3215 = vmatpush3.bf16.msra.mxu0 %v3551_v14 }
  0x85   : > { %3216 = vmatprep.subr.bf16.mxu0 %v3595_v1  ;;  %3071 = vmatpush3.bf16.msra.mxu1 %v3553_v16  ;;  %v1785_v14 = vsel %vm618_vm1, %v1780_v10, %v1784_v11  ;;  %v1786_v16 = vshrl.u32 %v3577_v4, 16 }
  0x86   : > { %3053 = vmatmul.mubr.bf16.gmra.mrb[8].mxu1 %v646_v17  ;;  %3072 = vmatprep.subr.bf16.mxu1 %v3595_v1  ;;  %v3581_v17 = vld [vmem:[%s4321_s1 + $0x238] sm:$0xff]  }
  0x87   : > { %3197 = vmatmul.mubr.bf16.gmra.mrb[8].mxu0 %v1534_v20  ;;  %3056 = vmatprep.mubr.msk.bf16.mxu1 %vm3596_vm0, %v3595_v1  ;;  %v1788_v19 = vor.u32 %v1786_v16, %v1784_v11  ;;  %v3584_v20 = vld [vmem:[%s3674_s10 + $0x1c] sm:$0xff]  }
  0x88   : > { %3217 = vmatpush3.bf16.msra.mxu0 %v3554_v21  ;;  %3200 = vmatprep.mubr.msk.bf16.mxu0 %vm3596_vm0, %v3595_v1  ;;  %v3585_v21 = vld [vmem:[%s3674_s10 + $0x24] sm:$0x1f]  }
  0x89   : > { %3073 = vmatpush3.bf16.msra.mxu1 %v3557_v24  ;;  %3218 = vmatprep.subr.bf16.mxu0 %v3595_v1  ;;  %v1999_v24 = vrot.slane %v3584_v20, 1  ;;  %v2001_v25 = vrot.slane %v3585_v21, 1 }
  0x8a   : > { %3074 = vmatprep.subr.bf16.mxu1 %v3595_v1 }
  0x8b   : > { %v2002_v28 = vsel %vm1993_vm2, %v1999_v24, %v2001_v25 }
  0x8c   : > { %3219 = vmatpush3.bf16.msra.mxu0 %v3558_v29  ;;  %v1996_v29 = vsel %vm1993_vm2, %v1994_v26, %v1995_v27 }
  0x8d   : > { %3075 = vmatpush3.bf16.msra.mxu1 %v3559_v30  ;;  %3220 = vmatprep.subr.bf16.mxu0 %v3595_v1  ;;  %v3586_v30 = vld [vmem:[%s3674_s10 + $0x14] sm:$0xff]   ;;  %s3441_s10 = smul.u32 36, %s4351_s13 }
  0x8e   : > { %3057 = vmatmul.mubr.bf16.gmra.mrb[12].mxu1 %v654_v31  ;;  %3076 = vmatprep.subr.bf16.mxu1 %v3595_v1  ;;  %v1997_v31 = vrot.slane %v3586_v30, 1 }
  0x8f   : > { %3201 = vmatmul.mubr.bf16.gmra.mrb[12].mxu0 %v1542_v32  ;;  %3060 = vmatprep.mubr.msk.bf16.mxu1 %vm3596_vm0, %v3595_v1  ;;  %s4191_s19 = scalar_lea.vmem %s4322_s2, %s3441_s10 }
  0x90   : > { %3204 = vmatprep.mubr.msk.bf16.mxu0 %vm3596_vm0, %v3595_v1  ;;  %3221 = vmatpush3.bf16.msra.mxu0 %v3560_v33  ;;  %v1998_v32 = vsel %vm1993_vm2, %v1995_v27, %v1997_v31  ;;  %v2000_v33 = vsel %vm1993_vm2, %v1997_v31, %v1999_v24 }
  0x91   : > { %3077 = vmatpush3.bf16.msra.mxu1 %v3561_v35  ;;  %3222 = vmatprep.subr.bf16.mxu0 %v3595_v1 }
  0x92   : > { %3078 = vmatprep.subr.bf16.mxu1 %v3595_v1 }
  0x94   : > { %3223 = vmatpush3.bf16.msra.mxu0 %v3562_v38  ;;  %v2210_v38 = vlaneseq }
  0x95   : > { %3079 = vmatpush3.bf16.msra.mxu1 %v3563_v41  ;;  %3244 = vmatprep.subr.bf16.mxu0 %v3595_v1 }
  0x96   : > { %3061 = vmatmul.mubr.bf16.gmra.mrb[16].mxu1 %v657_v42  ;;  %3280 = vmatprep.subr.bf16.mxu1 %v3595_v1  ;;  %v2211_v40 = vshrl.u32 %v2210_v38, 7 }
  0x97   : > { %3205 = vmatmul.mubr.bf16.gmra.mrb[16].mxu0 %v1545_v43  ;;  %3080 = vmatprep.mubr.msk.bf16.mxu1 %vm3596_vm0, %v3595_v1 }
  0x98   : > { %3224 = vmatprep.mubr.msk.bf16.mxu0 %vm3596_vm0, %v3595_v1  ;;  %v2212_v43 = vadd.s32 8, %v2211_v40  ;;  %v4088_v45 = vmul.u32.u64.low 3817748708, %v2211_v40  ;;  %v4089_v46 = vmul.u32.u64.high 3817748708, %v2211_v40, %v4088_v45  ;;  %v2213_v49 = vadd.s32 16, %v2211_v40 }
  0x99   : > { %v4112_v2 = vadd.s32 32, %v2211_v40  ;;  %v4114_v9 = vadd.s32 40, %v2211_v40 }
  0x9a   : > { %v2226_v54 = vshrl.u32 %v4089_v46, 3  ;;  %v4101_v56 = vmul.u32.u64.low 3817748708, %v2213_v49  ;;  %v4102_v57 = vmul.u32.u64.high 3817748708, %v2213_v49, %v4101_v56 }
  0x9b   : > { %v4127_v22 = vmul.u32.u64.low 3817748708, %v4114_v9  ;;  %v4128_v23 = vmul.u32.u64.high 3817748708, %v4114_v9, %v4127_v22 }
  0x9c   : > { %v2248_v16 = vshrl.u32 %v4102_v57, 3 }
  0x9d   : > { %v2281_v57 = vshrl.u32 %v4128_v23, 3 }
  0x9e   : > { %3081 = vmatmul.mubr.bf16.vlgmr.msra.gmra.mrb[0].mxu1 %v3564_v50 }
  0x9f   : > { %3225 = vmatmul.mubr.bf16.vlgmr.msra.gmra.mrb[0].mxu0 %v1761_v51  ;;  %3084 = vmatprep.mubr.msk.bf16.mxu1 %vm3596_vm0, %v3595_v1 }
  0xa0   : > { %3245 = vmatpush3.bf16.msra.mxu0 %v3567_v52  ;;  %3228 = vmatprep.mubr.msk.bf16.mxu0 %vm3596_vm0, %v3595_v1 }
  0xa1   : > { %3246 = vmatprep.subr.bf16.mxu0 %v3595_v1  ;;  %3288 = vmatpush3.bf16.msra.mxu1 %v3567_v52  ;;  %v4098_v52 = vadd.s32 24, %v2211_v40 }
  0xa2   : > { %3281 = vmatprep.subr.bf16.mxu1 %v3595_v1 }
  0xa4   : > { %3247 = vmatpush3.bf16.msra.mxu0 %v3568_v55 }
  0xa5   : > { %3248 = vmatprep.subr.bf16.mxu0 %v3595_v1  ;;  %3289 = vmatpush3.bf16.msra.mxu1 %v3568_v55  ;;  %v2217_v55 = vadd.s32 48, %v2211_v40 }
  0xa6   : > { %3085 = vmatmul.mubr.bf16.gmra.mrb[4].mxu1 %v3569_v59  ;;  %3282 = vmatprep.subr.bf16.mxu1 %v3595_v1 }
  0xa7   : > { %3229 = vmatmul.mubr.bf16.gmra.mrb[4].mxu0 %v1769_v60  ;;  %3088 = vmatprep.mubr.msk.bf16.mxu1 %vm3596_vm0, %v3595_v1  ;;  %v4106_v59 = vmul.u32.u64.low 3817748708, %v4098_v52  ;;  %v4107_v60 = vmul.u32.u64.high 3817748708, %v4098_v52, %v4106_v59  ;;  %v4109_v62 = vmul.u32.u64.low 3817748708, %v2217_v55  ;;  %v4110_v63 = vmul.u32.u64.high 3817748708, %v2217_v55, %v4109_v62 }
  0xa8   : > { %3249 = vmatpush3.bf16.msra.mxu0 %v3571_v61  ;;  %3232 = vmatprep.mubr.msk.bf16.mxu0 %vm3596_vm0, %v3595_v1 }
  0xa9   : > { %3250 = vmatprep.subr.bf16.mxu0 %v3595_v1  ;;  %3290 = vmatpush3.bf16.msra.mxu1 %v3571_v61  ;;  %v2227_v61 = vmul.u32 9, %v2226_v54  ;;  %v2259_v21 = vshrl.u32 %v4107_v60, 3  ;;  %v2292_v24 = vshrl.u32 %v4110_v63, 3 }
  0xaa   : > { %3283 = vmatprep.subr.bf16.mxu1 %v3595_v1 }
  0xab   : > { %v2293_v45 = vmul.u32 9, %v2292_v24 }
  0xac   : > { %3251 = vmatpush3.bf16.msra.mxu0 %v3574_v3 }
  0xad   : > { %3252 = vmatprep.subr.bf16.mxu0 %v3595_v1  ;;  %3291 = vmatpush3.bf16.msra.mxu1 %v3574_v3 }
  0xae   : > { %3089 = vmatmul.mubr.bf16.gmra.mrb[8].mxu1 %v3572_v5  ;;  %3284 = vmatprep.subr.bf16.mxu1 %v3595_v1 }
  0xaf   : > { %3233 = vmatmul.mubr.bf16.gmra.mrb[8].mxu0 %v1777_v6  ;;  %3092 = vmatprep.mubr.msk.bf16.mxu1 %vm3596_vm0, %v3595_v1 }
  0xb0   : > { %3253 = vmatpush3.bf16.msra.mxu0 %v3575_v7  ;;  %3236 = vmatprep.mubr.msk.bf16.mxu0 %vm3596_vm0, %v3595_v1 }
  0xb1   : > { %3292 = vmatpush3.bf16.msra.mxu1 %v3575_v7  ;;  %3254 = vmatprep.subr.bf16.mxu0 %v3595_v1 }
  0xb2   : > { %3285 = vmatprep.subr.bf16.mxu1 %v3595_v1 }
  0xb4   : > { %3255 = vmatpush3.bf16.msra.mxu0 %v3578_v12 }
  0xb5   : > { %3293 = vmatpush3.bf16.msra.mxu1 %v3578_v12  ;;  %3256 = vmatprep.subr.bf16.mxu0 %v3595_v1  ;;  %v2228_v12 = vsub.s32 %v2211_v40, %v2227_v61 }
  0xb6   : > { %3093 = vmatmul.mubr.bf16.gmra.mrb[12].mxu1 %v3576_v13  ;;  %3286 = vmatprep.subr.bf16.mxu1 %v3595_v1  ;;  %v4116_v13 = vadd.s32 56, %v2211_v40 }
  0xb7   : > { %3237 = vmatmul.mubr.bf16.gmra.mrb[12].mxu0 %v1785_v14  ;;  %3096 = vmatprep.mubr.msk.bf16.mxu1 %vm3596_vm0, %v3595_v1  ;;  %vm2319_vm3 = vcmp.ne.s32.totalorder %v2228_v12, 0  ;;  %vm2328_vm4 = vcmp.lt.s32.totalorder %v2228_v12, 0  ;;  %v2346_v31 = vadd.s32 9, %v2228_v12 }
  0xb8   : > { %3240 = vmatprep.mubr.msk.bf16.mxu0 %vm3596_vm0, %v3595_v1  ;;  %3257 = vmatpush3.bf16.msra.mxu0 %v3579_v15  ;;  %vm4143_vm7 = vmand %vm2328_vm4, %vm2319_vm3 }
  0xb9   : > { %3294 = vmatpush3.bf16.msra.mxu1 %v3579_v15  ;;  %3258 = vmatprep.subr.bf16.mxu0 %v3595_v1  ;;  %v2355_v54 = vsel %vm4143_vm7, %v2346_v31, %v2228_v12 }
  0xba   : > { %3287 = vmatprep.subr.bf16.mxu1 %v3595_v1  ;;  %vm4164_vm11 = vcmp.lt.s32.totalorder %v2355_v54, 8 }
  0xbc   : > { %3259 = vmatpush3.bf16.msra.mxu0 %v3581_v17 }
  0xbd   : > { %3295 = vmatpush3.bf16.msra.mxu1 %v3581_v17 }
  0xbe   : > { %3097 = vmatmul.mubr.bf16.gmra.mrb[16].mxu1 %v3580_v18  ;;  %v4120_v17 = vmul.u32.u64.low 3817748708, %v4112_v2  ;;  %v4121_v18 = vmul.u32.u64.high 3817748708, %v4112_v2, %v4120_v17 }
  0xbf   : > { %3241 = vmatmul.mubr.bf16.gmra.mrb[16].mxu0 %v1788_v19  ;;  %3272 = vmatprep.mubr.msk.bf16.mxu1 %vm3596_vm0, %v3595_v1  ;;  %v4123_v19 = vadd.s32 64, %v2211_v40  ;;  %v2260_v40 = vmul.u32 9, %v2259_v21 }
  0xc0   : > { %3260 = vmatprep.mubr.msk.bf16.mxu0 %vm3596_vm0, %v3595_v1 }
  0xc1   : > { %v4155_v56 = vsub.s32 %v4098_v52, %v2260_v40 }
  0xc3   : > { %vm2322_vm12 = vcmp.ne.s32.totalorder %v4155_v56, 0  ;;  %vm2331_vm13 = vcmp.lt.s32.totalorder %v4155_v56, 0 }
  0xc4   : > { %vm4205_vm1 = vmand %vm2331_vm13, %vm2322_vm12 }
  0xc6   : > { %3273 = vmatmul.mubr.bf16.vlgmr.msra.gmra.mrb[20].mxu1 %v2002_v28  ;;  %v2249_v28 = vmul.u32 9, %v2248_v16 }
  0xc7   : > { %3261 = vmatmul.mubr.bf16.vlgmr.msra.gmra.mrb[0].mxu0 %v1996_v29  ;;  %3276 = vmatprep.mubr.msk.bf16.mxu1 %vm3596_vm0, %v3595_v1 }
  0xc8   : > { %3264 = vmatprep.mubr.msk.bf16.mxu0 %vm3596_vm0, %v3595_v1 }
  0xce   : > { %3277 = vmatmul.mubr.bf16.gmra.mrb[24].mxu1 %v2001_v25  ;;  %v4132_v25 = vmul.u32.u64.low 3817748708, %v4116_v13  ;;  %v4133_v26 = vmul.u32.u64.high 3817748708, %v4116_v13, %v4132_v25 }
  0xcf   : > { %3265 = vmatmul.mubr.bf16.gmra.mrb[4].mxu0 %v1998_v32 }
  0xd0   : > { %3268 = vmatprep.mubr.msk.bf16.mxu0 %vm3596_vm0, %v3595_v1  ;;  %v4091_v1 = vmul.u32.u64.low 3817748708, %v2212_v43  ;;  %v4092_v47 = vmul.u32.u64.high 3817748708, %v2212_v43, %v4091_v1  ;;  %v2303_v59 = vshrl.u32 %v4133_v26, 3 }
  0xd2   : > { %v2237_v58 = vshrl.u32 %v4092_v47, 3  ;;  %v2250_v47 = vsub.s32 %v2213_v49, %v2249_v28  ;;  %v2304_v12 = vmul.u32 9, %v2303_v59 }
  0xd4   : > { %v2238_v8 = vmul.u32 9, %v2237_v58  ;;  %v4158_v58 = vsub.s32 %v2217_v55, %v2293_v45  ;;  %vm2321_vm9 = vcmp.ne.s32.totalorder %v2250_v47, 0  ;;  %vm2330_vm10 = vcmp.lt.s32.totalorder %v2250_v47, 0 }
  0xd5   : > { %v2348_v55 = vadd.s32 9, %v2250_v47  ;;  %vm4182_vm15 = vmand %vm2330_vm10, %vm2321_vm9 }
  0xd6   : > { %v2239_v20 = vsub.s32 %v2212_v43, %v2238_v8  ;;  %v2282_v8 = vmul.u32 9, %v2281_v57  ;;  %vm2325_vm0 = vcmp.ne.s32.totalorder %v4158_v58, 0  ;;  %vm2334_vm2 = vcmp.lt.s32.totalorder %v4158_v58, 0 }
  0xd7   : > { %3269 = vmatmul.mubr.bf16.gmra.mrb[8].mxu0 %v2000_v33  ;;  %v4136_v32 = vmul.u32.u64.low 3817748708, %v4123_v19  ;;  %v4137_v33 = vmul.u32.u64.high 3817748708, %v4123_v19, %v4136_v32  ;;  %v2352_v45 = vadd.s32 9, %v4158_v58 }
  0xd8   : > { %vm2320_vm5 = vcmp.ne.s32.totalorder %v2239_v20, 0  ;;  %vm2329_vm6 = vcmp.lt.s32.totalorder %v2239_v20, 0  ;;  %v2347_v1 = vadd.s32 9, %v2239_v20  ;;  %v4214_v25 = vsub.s32 %v4114_v9, %v2282_v8 }
  0xd9   : > { %vm4148_vm8 = vmand %vm2329_vm6, %vm2320_vm5 }
  0xda   : > { %v2356_v49 = vsel %vm4148_vm8, %v2347_v1, %v2239_v20  ;;  %vm2324_vm6 = vcmp.ne.s32.totalorder %v4214_v25, 0  ;;  %vm2333_vm7 = vcmp.lt.s32.totalorder %v4214_v25, 0 }
  0xdb   : > { %vm4174_vm14 = vcmp.lt.s32.totalorder %v2356_v49, 8 }
 0x171   : > { %v4080_v34 = vpop.f32.mrb[0].mxu1 }
 0x172   : > { %v3082_v35 = vpop.f32.mrb[1].mxu1 }
 0x173   : > { %v4082_v36 = vpop.f32.mrb[2].mxu1 }
 0x174   : > { %v3083_v37 = vpop.f32.mrb[3].mxu1 }
 0x179   : > { %v4084_v39 = vpop.f32.mrb[4].mxu1 }
 0x17a   : > { %v3086_v41 = vpop.f32.mrb[5].mxu1 }
 0x17b   : > { %v4086_v42 = vpop.f32.mrb[6].mxu1 }
 0x17c   : > { %v3087_v44 = vpop.f32.mrb[7].mxu1 }
 0x181   : > { %v4094_v48 = vpop.f32.mrb[8].mxu1 }
 0x182   : > { %v3090_v50 = vpop.f32.mrb[9].mxu1 }
 0x183   : > { %v4096_v51 = vpop.f32.mrb[10].mxu1  ;;  %v2270_v50 = vshrl.u32 %v4121_v18, 3  ;;  %v2349_v18 = vadd.s32 9, %v4155_v56 }
 0x184   : > { %v3091_v53 = vpop.f32.mrb[11].mxu1 }
 0x185   : > { %v2271_v61 = vmul.u32 9, %v2270_v50  ;;  %v2358_v31 = vsel %vm4205_vm1, %v2349_v18, %v4155_v56  ;;  %v2351_v56 = vadd.s32 9, %v4214_v25 }
 0x186   : > { %vm4243_vm9 = vcmp.lt.s32.totalorder %v2358_v31, 8 }
 0x187   : > { %v4196_v20 = vsub.s32 %v4112_v2, %v2271_v61  ;;  %v2357_v2 = vsel %vm4182_vm15, %v2348_v55, %v2250_v47 }
 0x188   : > { %vm4227_vm5 = vcmp.lt.s32.totalorder %v2357_v2, 8 }
 0x189   : > { %v970_v0 = vpop.f32.mrb[12].mxu1  ;;  %vm2323_vm3 = vcmp.ne.s32.totalorder %v4196_v20, 0  ;;  %vm2332_vm4 = vcmp.lt.s32.totalorder %v4196_v20, 0 }
 0x18a   : > { %v1900_v3 = vpop.f32.mrb[12].mxu0  ;;  %v3094_v4 = vpop.f32.mrb[13].mxu1  ;;  %vm4251_vm10 = vmand %vm2332_vm4, %vm2323_vm3 }
 0x18b   : > { %v3302_v5 = vadd.f32 %v1900_v3, %v970_v0  ;;  %v3238_v6 = vpop.f32.mrb[13].mxu0  ;;  %v973_v7 = vpop.f32.mrb[14].mxu1  ;;  %v2314_v3 = vshrl.u32 %v4137_v33, 3 }
 0x18c   : > { %v1903_v10 = vpop.f32.mrb[14].mxu0  ;;  %v3095_v11 = vpop.f32.mrb[15].mxu1 }
 0x18d   : > { %v3304_v14 = vadd.f32 %v1903_v10, %v973_v7  ;;  %v3239_v15 = vpop.f32.mrb[15].mxu0  ;;  %v2315_v22 = vmul.u32 9, %v2314_v3 }
 0x191   : > { %v978_v27 = vpop.f32.mrb[16].mxu1 }
 0x192   : > { %v1908_v29 = vpop.f32.mrb[16].mxu0  ;;  %v3098_v30 = vpop.f32.mrb[17].mxu1 }
 0x193   : > { %v4139_v35 = vadd.f32 %v1908_v29, %v978_v27  ;;  %v3242_v37 = vpop.f32.mrb[17].mxu0  ;;  %v981_v38 = vpop.f32.mrb[18].mxu1  ;;  %v4218_v29 = vsub.s32 %v4116_v13, %v2304_v12 }
 0x194   : > { %v1911_v41 = vpop.f32.mrb[18].mxu0  ;;  %v3099_v43 = vpop.f32.mrb[19].mxu1  ;;  %v2316_v37 = vsub.s32 %v4123_v19, %v2315_v22 }
 0x195   : > { %v3243_v46 = vpop.f32.mrb[19].mxu0  ;;  %v2350_v43 = vadd.s32 9, %v4196_v20  ;;  %vm2326_vm8 = vcmp.ne.s32.totalorder %v4218_v29, 0  ;;  %vm2335_vm12 = vcmp.lt.s32.totalorder %v4218_v29, 0  ;;  %v2353_v57 = vadd.s32 9, %v4218_v29 }
 0x196   : > { %vm2327_vm13 = vcmp.ne.s32.totalorder %v2316_v37, 0  ;;  %vm2336_vm15 = vcmp.lt.s32.totalorder %v2316_v37, 0 }
 0x197   : > { %vm4298_vm1 = vmand %vm2336_vm15, %vm2327_vm13 }
 0x199   : > { %v2114_v60 = vpop.f32.mrb[20].mxu1 }
 0x19a   : > { %v2090_v62 = vpop.f32.mrb[0].mxu0  ;;  %v4168_v52 = vadd.f32 %v3302_v5, %v2114_v60  ;;  %v3274_v0 = vpop.f32.mrb[21].mxu1 }
 0x19b   : > { %v3296_v4 = vadd.f32 %v2090_v62, %v4080_v34  ;;  %v3262_v6 = vpop.f32.mrb[1].mxu0  ;;  %v2117_v7 = vpop.f32.mrb[22].mxu1  ;;  %v2359_v62 = vsel %vm4251_vm10, %v2350_v43, %v4196_v20 }
 0x19c   : > { %v2093_v10 = vpop.f32.mrb[2].mxu0  ;;  %v4178_v5 = vadd.f32 %v3304_v14, %v2117_v7  ;;  %v3275_v15 = vpop.f32.mrb[23].mxu1  ;;  %v2354_v6 = vadd.s32 9, %v2316_v37 }
 0x19d   : > { %v2409_v16 = vsel %vm4164_vm11, %v3296_v4, 0.0  ;;  %v3297_v14 = vadd.f32 %v2093_v10, %v4082_v36  ;;  %v3263_v17 = vpop.f32.mrb[3].mxu0  ;;  %vm4259_vm11 = vmand %vm2334_vm2, %vm2325_vm0  ;;  %vm2368_vm2 = vcmp.lt.s32.totalorder %v2359_v62, 8 }
 0x19e   : > { %v2834_v21 = vpack.c.bf16 %v4178_v5, %v4168_v52  ;;  %v2433_v26 = vmul.f32 %v2409_v16, %v2409_v16  ;;  %vm4287_vm0 = vmand %vm2335_vm12, %vm2326_vm8 }
 0x19f   : > { %v2819_v36 = vpack.c.bf16 %v3297_v14, %v3296_v4  ;;  %v2410_v24 = vsel %vm4174_vm14, %v3297_v14, 0.0  ;;  %vm4274_vm14 = vmand %vm2333_vm7, %vm2324_vm6  ;;  %v2361_v4 = vsel %vm4259_vm11, %v2352_v45, %v4158_v58  ;;  %v2362_v12 = vsel %vm4287_vm0, %v2353_v57, %v4218_v29 }
 0x1a0   : > { %v2418_v27 = vadd.f32 %v2410_v24, %v2409_v16  ;;  %v2434_v28 = vmul.f32 %v2410_v24, %v2410_v24  ;;  %2838 = vst [vmem:[%s4191_s19 + $0x18] sm:$0xff] %v2834_v21   ;;  %v2360_v7 = vsel %vm4274_vm14, %v2351_v56, %v4214_v25  ;;  %vm2370_vm3 = vcmp.lt.s32.totalorder %v2361_v4, 8 }
 0x1a1   : > { %2820 = vst [vmem:[%s4191_s19] sm:$0xff] %v2819_v36   ;;  %v2122_v30 = vpop.f32.mrb[24].mxu1  ;;  %vm2369_vm4 = vcmp.lt.s32.totalorder %v2360_v7, 8  ;;  %v2363_v16 = vsel %vm4298_vm1, %v2354_v6, %v2316_v37  ;;  %v2415_v22 = vsel %vm2370_vm3, %v4168_v52, 0.0 }
 0x1a2   : > { %v2442_v9 = vadd.f32 %v2434_v28, %v2433_v26  ;;  %v2098_v32 = vpop.f32.mrb[4].mxu0  ;;  %v4232_v13 = vadd.f32 %v4139_v35, %v2122_v30  ;;  %v3278_v38 = vpop.f32.mrb[25].mxu1  ;;  %vm2372_vm6 = vcmp.lt.s32.totalorder %v2363_v16, 8  ;;  %v2439_v26 = vmul.f32 %v2415_v22, %v2415_v22 }
 0x1a3   : > { %v3298_v40 = vadd.f32 %v2098_v32, %v4084_v39  ;;  %v3266_v41 = vpop.f32.mrb[5].mxu0  ;;  %v2125_v44 = vpop.f32.mrb[26].mxu1 }
 0x1a4   : > { %v2815_v35 = vpack.c.bf16 %v4232_v13, %v4232_v13  ;;  %v2101_v19 = vpop.f32.mrb[6].mxu0  ;;  %v3279_v1 = vpop.f32.mrb[27].mxu1 }
 0x1a5   : > { %v2411_v50 = vsel %vm4227_vm5, %v3298_v40, 0.0  ;;  %v3299_v53 = vadd.f32 %v2101_v19, %v4086_v42  ;;  %v3267_v54 = vpop.f32.mrb[7].mxu0  ;;  %vm2371_vm5 = vcmp.lt.s32.totalorder %v2362_v12, 8 }
 0x1a6   : > { %v2419_v59 = vadd.f32 %v2418_v27, %v2411_v50  ;;  %v2435_v60 = vmul.f32 %v2411_v50, %v2411_v50  ;;  %2209 = vst [vmem:[%s4191_s19 + $0x20] sm:$0xf] %v2815_v35  ;;  %v2416_v25 = vsel %vm2371_vm5, %v4178_v5, 0.0 }
 0x1a7   : > { %v2824_v42 = vpack.c.bf16 %v3299_v53, %v3298_v40  ;;  %v2412_v61 = vsel %vm4243_vm9, %v3299_v53, 0.0  ;;  %v2440_v29 = vmul.f32 %v2416_v25, %v2416_v25 }
 0x1a8   : > { %v2443_v0 = vadd.f32 %v2442_v9, %v2435_v60  ;;  %v2420_v55 = vadd.f32 %v2419_v59, %v2412_v61  ;;  %v2436_v3 = vmul.f32 %v2412_v61, %v2412_v61 }
 0x1a9   : > { %2836 = vst [vmem:[%s4191_s19 + $0x8] sm:$0xff] %v2824_v42  }
 0x1aa   : > { %v2444_v10 = vadd.f32 %v2443_v0, %v2436_v3  ;;  %v2106_v11 = vpop.f32.mrb[8].mxu0 }
 0x1ab   : > { %v3300_v15 = vadd.f32 %v2106_v11, %v4094_v48  ;;  %v3270_v58 = vpop.f32.mrb[9].mxu0 }
 0x1ac   : > { %v2109_v34 = vpop.f32.mrb[10].mxu0 }
 0x1ad   : > { %v2413_v14 = vsel %vm2368_vm2, %v3300_v15, 0.0  ;;  %v3301_v17 = vadd.f32 %v2109_v34, %v4096_v51  ;;  %v3271_v18 = vpop.f32.mrb[11].mxu0  ;;  %v2417_v51 = vsel %vm2372_vm6, %v4232_v13, 0.0 }
 0x1ae   : > { %v2421_v20 = vadd.f32 %v2420_v55, %v2413_v14  ;;  %v2437_v21 = vmul.f32 %v2413_v14, %v2413_v14  ;;  %v2441_v9 = vmul.f32 %v2417_v51, %v2417_v51 }
 0x1af   : > { %v2829_v23 = vpack.c.bf16 %v3301_v17, %v3300_v15  ;;  %v2414_v36 = vsel %vm2369_vm4, %v3301_v17, 0.0 }
 0x1b0   : > { %v2445_v48 = vadd.f32 %v2444_v10, %v2437_v21  ;;  %v2422_v24 = vadd.f32 %v2421_v20, %v2414_v36  ;;  %v2438_v2 = vmul.f32 %v2414_v36, %v2414_v36 }
 0x1b1   : > { %2837 = vst [vmem:[%s4191_s19 + $0x10] sm:$0xff] %v2829_v23  }
 0x1b2   : > { %v2423_v27 = vadd.f32 %v2422_v24, %v2415_v22  ;;  %v2446_v28 = vadd.f32 %v2445_v48, %v2438_v2 }
 0x1b4   : > { %v2424_v30 = vadd.f32 %v2423_v27, %v2416_v25  ;;  %v2447_v31 = vadd.f32 %v2446_v28, %v2439_v26 }
 0x1b6   : > { %v2425_v52 = vadd.f32 %v2424_v30, %v2417_v51  ;;  %v2448_v32 = vadd.f32 %v2447_v31, %v2440_v29 }
 0x1b8   : > { %v2426_v33 = vrot.slane %v2425_v52, 4  ;;  %v2449_v37 = vadd.f32 %v2448_v32, %v2441_v9 }
 0x1ba   : > { %v2427_v38 = vadd.f32 %v2426_v33, %v2425_v52  ;;  %v2450_v40 = vrot.slane %v2449_v37, 4 }
 0x1bc   : > { %v2428_v41 = vrot.slane %v2427_v38, 2  ;;  %v2451_v43 = vadd.f32 %v2450_v40, %v2449_v37 }
 0x1be   : > { %v2429_v5 = vadd.f32 %v2428_v41, %v2427_v38  ;;  %v2452_v44 = vrot.slane %v2451_v43, 2 }
 0x1c0   : > { %v2430_v45 = vrot.slane %v2429_v5, 1  ;;  %v2453_v35 = vadd.f32 %v2452_v44, %v2451_v43 }
 0x1c2   : > { %v2431_v13 = vadd.f32 %v2430_v45, %v2429_v5  ;;  %v2454_v19 = vrot.slane %v2453_v35, 1 }
 0x1c4   : > { %2432 = vst [vmem:[%s181_s23] sm:$0x1] %v2431_v13  ;;  %v2455_v46 = vadd.f32 %v2454_v19, %v2453_v35 }
 0x1c6   : > { %2456 = vst [vmem:[%s181_s23 + $0x1] sm:$0x1] %v2455_v46 }
 0x1c7 PF: > { %s14_s12 = sadd.s32 1, %s3593_s12  }
 0x1c8   : > { %p11_p4 = scmp.ge.s32.totalorder %s14_s12, 4  }
 0x1ca   :  { %13 = sbr.rel (!%p11_p4) target bundleno = 1 (0x1), region = 78 }

// kernel: block_forward.6
= control target key start
LH: loop header
LB: loop body
LE: loop exit
PB: predicated region body
PF: predicated region fallthrough
CT: control target
= control target key end

     0   :  { %s2347_s12 = smov 0   ;;  %s2646_s0 = inlined_call_operand.vmem [shape: bf16[2,128,128], index: 0, kind: input, shape index: {}]   ;;  %s2647_s1 = inlined_call_operand.vmem [shape: bf16[9,128,128], index: 1, kind: input, shape index: {}]   ;;  %s2648_s2 = inlined_call_operand.vmem [shape: bf16[2,24,128], index: 2, kind: output, shape index: {0}]   ;;  %s2649_s3 = inlined_call_operand.vmem [shape: f32[2,2,128], index: 3, kind: output, shape index: {1}]  }
   0x1 LB: > { %s1672_s13 = sadd.s32 4294967295, %s2325_s12   ;;  %p1676_p0 = scmp.ge.s32.totalorder %s2325_s12, 1  ;;  %s2325_s12 = sphi %s2347_s12, %s14_s12  }
   0x2   : > { %p140_p1 = scmp.lt.s32.totalorder %s2325_s12, 3 }
   0x4   : > { %p141_p2 = pnand %p1676_p0, %p140_p1 }
   0x5   : > { %v2229_v0 = vld [vmem:[%s2647_s1] sm:$0xff] (!%p141_p2)   ;;  %v2231_v2 = vld [vmem:[%s2647_s1 + $0x8] sm:$0xff] (!%p141_p2)   ;;  %p168_p3 = scmp.lt.s32.totalorder (!%p141_p2), %s1672_s13, 1  ;;  %v2233_v4 = vld [vmem:[%s2647_s1 + $0x10] sm:$0xff] (!%p141_p2)   ;;  %vm477_vm0 = vsmask.f32 (!%p141_p2), 7424 }
   0x6   : > { %144 = sbr.rel (%p141_p2) target bundleno = 404 (0x194), region = 28  ;;  %v2230_v1 = vld [vmem:[%s2647_s1 + $0x100] sm:$0xff] (!%p141_p2)   ;;  %2003 = vmatprep.subr.bf16.mxu1 (!%p141_p2), %v2229_v0  ;;  %v2232_v3 = vld [vmem:[%s2647_s1 + $0x108] sm:$0xff] (!%p141_p2)   ;;  %v2234_v5 = vld [vmem:[%s2647_s1 + $0x110] sm:$0xff] (!%p141_p2)   ;;  %vm1054_vm1 = vsmask.f32 (!%p141_p2), 5376 }
   0x7   : > { %2083 = vmatprep.subr.bf16.mxu0 (!%p141_p2), %v2230_v1  ;;  %2004 = vmatpush3.bf16.msra.mxu1 (!%p141_p2), %v2229_v0  ;;  %v2235_v6 = vld [vmem:[%s2647_s1 + $0x18] sm:$0xff] (!%p141_p2)   ;;  %v2237_v8 = vld [vmem:[%s2647_s1 + $0x20] sm:$0xff] (!%p141_p2)   ;;  %v2239_v10 = vld [vmem:[%s2647_s1 + $0x28] sm:$0xff] (!%p141_p2)   ;;  %vm1365_vm2 = vcmask (!%p141_p2), 1044480  }
   0x8   : > { %2084 = vmatpush3.bf16.msra.mxu0 (!%p141_p2), %v2230_v1  ;;  %2005 = vmatprep.subr.bf16.mxu1 (!%p141_p2), %v2231_v2  ;;  %v2236_v7 = vld [vmem:[%s2647_s1 + $0x118] sm:$0xff] (!%p141_p2)   ;;  %v2238_v9 = vld [vmem:[%s2647_s1 + $0x120] sm:$0xff] (!%p141_p2)   ;;  %v2240_v12 = vld [vmem:[%s2647_s1 + $0x128] sm:$0xff] (!%p141_p2)  }
   0x9   : > { %2085 = vmatprep.subr.bf16.mxu0 (!%p141_p2), %v2232_v3  ;;  %v2241_v14 = vld [vmem:[%s2647_s1 + $0x30] sm:$0xff] (!%p141_p2)   ;;  %v2243_v16 = vld [vmem:[%s2647_s1 + $0x38] sm:$0xff] (!%p141_p2)   ;;  %v2246_v18 = vld [vmem:[%s2647_s1 + $0x40] sm:$0xff] (!%p141_p2)  }
   0xa   : > { %v2242_v15 = vld [vmem:[%s2647_s1 + $0x130] sm:$0xff] (!%p141_p2)   ;;  %v2244_v17 = vld [vmem:[%s2647_s1 + $0x138] sm:$0xff] (!%p141_p2)   ;;  %v2248_v19 = vld [vmem:[%s2647_s1 + $0x140] sm:$0xff] (!%p141_p2)  }
   0xb   : > { %2006 = vmatpush3.bf16.msra.mxu1 (!%p141_p2), %v2231_v2  ;;  %v2251_v22 = vld [vmem:[%s2647_s1 + $0x48] sm:$0xff] (!%p141_p2)   ;;  %v2253_v24 = vld [vmem:[%s2647_s1 + $0x50] sm:$0xff] (!%p141_p2)   ;;  %v2255_v31 = vld [vmem:[%s2647_s1 + $0x58] sm:$0xff] (!%p141_p2)  }
   0xc   : > { %2086 = vmatpush3.bf16.msra.mxu0 (!%p141_p2), %v2232_v3  ;;  %2007 = vmatprep.subr.bf16.mxu1 (!%p141_p2), %v2233_v4  ;;  %v2252_v23 = vld [vmem:[%s2647_s1 + $0x148] sm:$0xff] (!%p141_p2)   ;;  %v2254_v26 = vld [vmem:[%s2647_s1 + $0x150] sm:$0xff] (!%p141_p2)   ;;  %v2256_v32 = vld [vmem:[%s2647_s1 + $0x158] sm:$0xff] (!%p141_p2)  }
   0xd   : > { %s2653_s13 = smov (!%p168_p3, %s1672_s13), 1  ;;  %2087 = vmatprep.subr.bf16.mxu0 %v2234_v5  ;;  %v2257_v37 = vld [vmem:[%s2647_s1 + $0x60] sm:$0xff]   ;;  %v2259_v40 = vld [vmem:[%s2647_s1 + $0x68] sm:$0xff]   ;;  %v2261_v42 = vld [vmem:[%s2647_s1 + $0x70] sm:$0xff]  }
   0xe   : > { %s1904_s30 = sshll.u32 %s2653_s13, 6  ;;  %v2258_v38 = vld [vmem:[%s2647_s1 + $0x160] sm:$0xff]   ;;  %v2260_v41 = vld [vmem:[%s2647_s1 + $0x168] sm:$0xff]   ;;  %v2262_v43 = vld [vmem:[%s2647_s1 + $0x170] sm:$0xff]   ;;  %s2214_s16 = smul.u32 12, %s2653_s13 }
   0xf   : > { %2008 = vmatpush3.bf16.msra.mxu1 %v2233_v4  ;;  %s2391_s10 = scalar_lea.vmem %s2646_s0, %s1904_s30  ;;  %v2263_v44 = vld [vmem:[%s2647_s1 + $0x78] sm:$0xff]   ;;  %v2266_v48 = vld [vmem:[%s2647_s1 + $0x80] sm:$0xff]   ;;  %v2271_v62 = vld [vmem:[%s2647_s1 + $0x88] sm:$0xff]   ;;  %s1680_s20 = sshll.u32 %s2653_s13, 1 }
  0x10   : > { %2088 = vmatpush3.bf16.msra.mxu0 %v2234_v5  ;;  %2009 = vmatprep.subr.bf16.mxu1 %v2235_v6  ;;  %v2245_v11 = vld [vmem:[%s2391_s10] sm:$0xff]   ;;  %v2247_v13 = vld [vmem:[%s2391_s10 + $0x30] sm:$0xff]   ;;  %v2249_v20 = vld [vmem:[%s2391_s10 + $0x8] ss:$0 sps:$4 sm:$0xff]   ;;  %s177_s19 = scalar_lea.vmem %s2648_s2, %s2214_s16  ;;  %s181_s23 = scalar_lea.vmem %s2649_s3, %s1680_s20 }
  0x11   : > { %2089 = vmatprep.subr.bf16.mxu0 %v2236_v7  ;;  %2019 = vmatprep.mubr.bf16.mxu1 %v2245_v11  ;;  %v2250_v21 = vld [vmem:[%s2391_s10 + $0x38] ss:$0 sps:$4 sm:$0xff]   ;;  %v2265_v25 = vld [vmem:[%s2391_s10 + $0x10] sm:$0xff]   ;;  %v2267_v27 = vld [vmem:[%s2391_s10 + $0x20] sm:$0xff]  }
  0x12   : > { %2099 = vmatprep.mubr.bf16.mxu0 %v2247_v13  ;;  %v2268_v28 = vld [vmem:[%s2391_s10 + $0x28] sm:$0x1f]   ;;  %v902_v29 = vshrl.u32 %v2267_v27, 16  ;;  %v904_v30 = vshll.u32 %v2267_v27, 16  ;;  %v2264_v45 = vld [vmem:[%s2647_s1 + $0x178] sm:$0xff]   ;;  %v2285_v46 = vld [vmem:[%s2391_s10] sm:$0xff]  }
  0x13   : > { %2010 = vmatpush3.bf16.msra.mxu1 %v2235_v6  ;;  %v909_v34 = vshll.u32 %v2268_v28, 16  ;;  %v2469_v47 = vld [vmem:[%s2391_s10 + $0x8] sm:$0x1f]   ;;  %v2269_v49 = vld [vmem:[%s2647_s1 + $0x180] sm:$0xff]   ;;  %v913_v50 = vshrl.u32 %v2268_v28, 16  ;;  %v479_v51 = vshrl.u32 %v2285_v46, 16 }
  0x14   : > { %2090 = vmatpush3.bf16.msra.mxu0 %v2236_v7  ;;  %2011 = vmatprep.subr.bf16.mxu1 %v2237_v8  ;;  %v906_v33 = vrot.slane %v904_v30, 1  ;;  %v481_v52 = vshll.u32 %v2285_v46, 16  ;;  %v486_v53 = vshll.u32 %v2469_v47, 16  ;;  %v2288_v54 = vld [vmem:[%s2391_s10] sm:$0xfc]   ;;  %v2272_v63 = vld [vmem:[%s2647_s1 + $0x188] sm:$0xff]  }
  0x15   : > { %2091 = vmatprep.subr.bf16.mxu0 %v2238_v9  ;;  %v911_v36 = vrot.slane %v909_v34, 1  ;;  %v2270_v55 = vld [vmem:[%s2391_s10 + $0x18] ss:$0 sps:$4 sm:$0xff]   ;;  %v2289_v58 = vld [vmem:[%s2391_s10 + $0x8] sm:$0x7f]   ;;  %v1056_v59 = vshrl.u32 %v2288_v54, 16 }
  0x16   : > { %v907_v35 = vor.u32 %v906_v33, %v902_v29  ;;  %v483_v56 = vrot.slane %v481_v52, 1  ;;  %v2480_v57 = vrot.slane %v486_v53, 1  ;;  %v1059_v60 = vshll.u32 %v2288_v54, 16  ;;  %v2274_v11 = vld [vmem:[%s2647_s1 + $0x190] sm:$0xff]   ;;  %v2275_v13 = vld [vmem:[%s2647_s1 + $0x98] sm:$0xff]   ;;  %v2287_v34 = vld [vmem:[%s2647_s1 + $0xc0] sm:$0xff]  }
  0x17   : > { %2012 = vmatpush3.bf16.msra.mxu1 %v2237_v8  ;;  %v915_v61 = vor.u32 %v913_v50, %v911_v36  ;;  %v1064_v1 = vshrl.u32 %v2289_v58, 16  ;;  %v1067_v2 = vshll.u32 %v2289_v58, 16  ;;  %v1058_v3 = vrot.slane %v1056_v59, 2  ;;  %v2283_v27 = vld [vmem:[%s2647_s1 + $0xb8] sm:$0xff]   ;;  %v2300_v50 = vld [vmem:[%s2647_s1 + $0x1e8] sm:$0xff]   ;;  %v2302_v52 = vld [vmem:[%s2647_s1 + $0x1f0] sm:$0xff]  }
  0x18   : > { %2092 = vmatpush3.bf16.msra.mxu0 %v2238_v9  ;;  %2013 = vmatprep.subr.bf16.mxu1 %v2239_v10  ;;  %v912_v39 = vsel %vm477_vm0, %v907_v35, %v911_v36  ;;  %v484_v0 = vor.u32 %v483_v56, %v479_v51  ;;  %v1061_v4 = vrot.slane %v1059_v60, 3  ;;  %v2284_v28 = vld [vmem:[%s2647_s1 + $0x1b8] sm:$0xff]   ;;  %v490_v29 = vshrl.u32 %v2469_v47, 16  ;;  %v2290_v35 = vld [vmem:[%s2647_s1 + $0x1c0] sm:$0xff]   ;;  %v2301_v51 = vld [vmem:[%s2647_s1 + $0xf0] sm:$0xff]  }
  0x19   : > { %2093 = vmatprep.subr.bf16.mxu0 %v2240_v12  ;;  %v1066_v5 = vrot.slane %v1064_v1, 2  ;;  %v1069_v6 = vrot.slane %v1067_v2, 3  ;;  %v2296_v46 = vld [vmem:[%s2647_s1 + $0x1d8] sm:$0xff]   ;;  %v2297_v47 = vld [vmem:[%s2647_s1 + $0xe0] sm:$0xff]   ;;  %v2318_v56 = vld [vmem:[%s2391_s10 + $0x8] sm:$0x7f]  }
  0x1a   : > { %v489_v7 = vsel %vm477_vm0, %v484_v0, %v2480_v57  ;;  %v1062_v8 = vor.u32 %v1061_v4, %v1058_v3  ;;  %v492_v36 = vor.u32 %v490_v29, %v2480_v57  ;;  %v2303_v53 = vld [vmem:[%s2647_s1 + $0xf8] sm:$0xff]   ;;  %v2309_v57 = vld [vmem:[%s2647_s1 + $0x200] sm:$0xff]   ;;  %v1367_v59 = vrot.slane %v2318_v56, 3  ;;  %v2306_v60 = vld [vmem:[%s2391_s10 + $0x28] ss:$0 sps:$4 sm:$0xff]  }
  0x1b   : > { %2014 = vmatpush3.bf16.msra.mxu1 %v2239_v10  ;;  %v2491_v9 = vor.u32 %v1069_v6, %v1066_v5  ;;  %v2273_v10 = vld [vmem:[%s2647_s1 + $0x90] sm:$0xff]   ;;  %v2304_v54 = vld [vmem:[%s2647_s1 + $0x1f8] sm:$0xff]   ;;  %v2313_v1 = vld [vmem:[%s2647_s1 + $0x220] sm:$0xff]   ;;  %v1495_v5 = vlaneseq }
  0x1c   : > { %2094 = vmatpush3.bf16.msra.mxu0 %v2240_v12  ;;  %2015 = vmatprep.subr.bf16.mxu1 %v2241_v14  ;;  %v2312_v0 = vld [vmem:[%s2647_s1 + $0x218] sm:$0xff]   ;;  %v2314_v2 = vld [vmem:[%s2647_s1 + $0x228] sm:$0xff]   ;;  %v2315_v3 = vld [vmem:[%s2647_s1 + $0x230] sm:$0xff]  }
  0x1d   : > { %2095 = vmatprep.subr.bf16.mxu0 %v2242_v15  ;;  %v1071_v12 = vsel %vm1054_vm1, %v1062_v8, %v2491_v9  ;;  %v2316_v4 = vld [vmem:[%s2647_s1 + $0x238] sm:$0xff]   ;;  %v1496_v6 = vshrl.u32 %v1495_v5, 7 }
  0x1f   : > { %2016 = vmatpush3.bf16.msra.mxu1 %v2241_v14  ;;  %v2276_v14 = vld [vmem:[%s2647_s1 + $0x198] sm:$0xff]   ;;  %v1498_v8 = vadd.s32 16, %v1496_v6 }
  0x20   : > { %2096 = vmatpush3.bf16.msra.mxu0 %v2242_v15  ;;  %2017 = vmatprep.subr.bf16.mxu1 %v2243_v16  ;;  %v2277_v15 = vld [vmem:[%s2647_s1 + $0xa0] sm:$0xff]  }
  0x21   : > { %2097 = vmatprep.subr.bf16.mxu0 %v2244_v17  ;;  %vm1552_vm13 = vcmp.lt.s32.totalorder %v1498_v8, 20 }
  0x23   : > { %2018 = vmatpush3.bf16.msra.mxu1 %v2243_v16  ;;  %v2278_v16 = vld [vmem:[%s2647_s1 + $0x1a0] sm:$0xff]  }
  0x24   : > { %2098 = vmatpush3.bf16.msra.mxu0 %v2244_v17  ;;  %2023 = vmatprep.subr.bf16.mxu1 %v2246_v18  ;;  %v2279_v17 = vld [vmem:[%s2647_s1 + $0xa8] sm:$0xff]  }
  0x25   : > { %2103 = vmatprep.subr.bf16.mxu0 %v2248_v19 }
  0x26   : > { %2020 = vmatmul.mubr.bf16.vlgmr.msra.gmra.mrb[0].mxu1 %v2249_v20  ;;  %v2308_v20 = vld [vmem:[%s2391_s10 + $0x18] sm:$0x7f]  }
  0x27   : > { %2024 = vmatpush3.bf16.msra.mxu1 %v2246_v18  ;;  %2100 = vmatmul.mubr.bf16.vlgmr.msra.gmra.mrb[0].mxu0 %v2250_v21  ;;  %v2280_v18 = vld [vmem:[%s2647_s1 + $0x1a8] sm:$0xff]   ;;  %v2281_v21 = vld [vmem:[%s2647_s1 + $0xb0] sm:$0xff]  }
  0x28   : > { %2104 = vmatpush3.bf16.msra.mxu0 %v2248_v19  ;;  %2025 = vmatprep.subr.bf16.mxu1 %v2251_v22  ;;  %v2307_v19 = vld [vmem:[%s2391_s10 + $0x10] sm:$0xfc]  }
  0x29   : > { %2105 = vmatprep.subr.bf16.mxu0 %v2252_v23  ;;  %2039 = vmatprep.mubr.bf16.mxu1 %v2265_v25  ;;  %v1219_v25 = vshrl.u32 %v2308_v20, 16 }
  0x2a   : > { %2119 = vmatprep.mubr.bf16.mxu0 %v912_v39  ;;  %v2291_v39 = vld [vmem:[%s2647_s1 + $0xc8] sm:$0xff]  }
  0x2b   : > { %2026 = vmatpush3.bf16.msra.mxu1 %v2251_v22  ;;  %v2282_v22 = vld [vmem:[%s2647_s1 + $0x1b0] sm:$0xff]  }
  0x2c   : > { %2106 = vmatpush3.bf16.msra.mxu0 %v2252_v23  ;;  %2027 = vmatprep.subr.bf16.mxu1 %v2253_v24  ;;  %v1211_v23 = vshrl.u32 %v2307_v19, 16 }
  0x2d   : > { %2107 = vmatprep.subr.bf16.mxu0 %v2254_v26 }
  0x2e   : > { %v1213_v30 = vrot.slane %v1211_v23, 2 }
  0x2f   : > { %2028 = vmatpush3.bf16.msra.mxu1 %v2253_v24  ;;  %v1214_v24 = vshll.u32 %v2307_v19, 16 }
  0x30   : > { %2108 = vmatpush3.bf16.msra.mxu0 %v2254_v26  ;;  %2029 = vmatprep.subr.bf16.mxu1 %v2255_v31  ;;  %v1222_v26 = vshll.u32 %v2308_v20, 16 }
  0x31   : > { %2109 = vmatprep.subr.bf16.mxu0 %v2256_v32 }
  0x32   : > { %v1224_v33 = vrot.slane %v1222_v26, 3 }
  0x33   : > { %2030 = vmatpush3.bf16.msra.mxu1 %v2255_v31  ;;  %v1216_v31 = vrot.slane %v1214_v24, 3 }
  0x34   : > { %2110 = vmatpush3.bf16.msra.mxu0 %v2256_v32  ;;  %2031 = vmatprep.subr.bf16.mxu1 %v2257_v37  ;;  %v1221_v32 = vrot.slane %v1219_v25, 2 }
  0x35   : > { %2111 = vmatprep.subr.bf16.mxu0 %v2258_v38 }
  0x37   : > { %2032 = vmatpush3.bf16.msra.mxu1 %v2257_v37  ;;  %v1217_v37 = vor.u32 %v1216_v31, %v1213_v30 }
  0x38   : > { %2112 = vmatpush3.bf16.msra.mxu0 %v2258_v38  ;;  %2033 = vmatprep.subr.bf16.mxu1 %v2259_v40  ;;  %v2541_v38 = vor.u32 %v1224_v33, %v1221_v32 }
  0x39   : > { %2113 = vmatprep.subr.bf16.mxu0 %v2260_v41 }
  0x3b   : > { %2034 = vmatpush3.bf16.msra.mxu1 %v2259_v40  ;;  %v2292_v40 = vld [vmem:[%s2647_s1 + $0x1c8] sm:$0xff]  }
  0x3c   : > { %2114 = vmatpush3.bf16.msra.mxu0 %v2260_v41  ;;  %2035 = vmatprep.subr.bf16.mxu1 %v2261_v42  ;;  %v2305_v41 = vld [vmem:[%s2391_s10 + $0x20] sm:$0xff]  }
  0x3d   : > { %2115 = vmatprep.subr.bf16.mxu0 %v2262_v43 }
  0x3f   : > { %2036 = vmatpush3.bf16.msra.mxu1 %v2261_v42  ;;  %v1226_v42 = vsel %vm1054_vm1, %v1217_v37, %v2541_v38 }
  0x40   : > { %2116 = vmatpush3.bf16.msra.mxu0 %v2262_v43  ;;  %2037 = vmatprep.subr.bf16.mxu1 %v2263_v44  ;;  %v2293_v43 = vld [vmem:[%s2647_s1 + $0xd0] sm:$0xff]  }
  0x41   : > { %2117 = vmatprep.subr.bf16.mxu0 %v2264_v45 }
  0x43   : > { %2038 = vmatpush3.bf16.msra.mxu1 %v2263_v44  ;;  %v2294_v44 = vld [vmem:[%s2647_s1 + $0x1d0] sm:$0xff]  }
  0x44   : > { %2118 = vmatpush3.bf16.msra.mxu0 %v2264_v45  ;;  %2043 = vmatprep.subr.bf16.mxu1 %v2266_v48  ;;  %v2295_v45 = vld [vmem:[%s2647_s1 + $0xd8] sm:$0xff]  }
  0x45   : > { %2123 = vmatprep.subr.bf16.mxu0 %v2269_v49 }
  0x46   : > { %2040 = vmatmul.mubr.bf16.vlgmr.msra.gmra.mrb[0].mxu1 %v2270_v55  ;;  %v2317_v55 = vld [vmem:[%s2391_s10] sm:$0xf8]  }
  0x47   : > { %2044 = vmatpush3.bf16.msra.mxu1 %v2266_v48  ;;  %2120 = vmatmul.mubr.bf16.vlgmr.msra.gmra.mrb[0].mxu0 %v915_v61  ;;  %v2298_v48 = vld [vmem:[%s2647_s1 + $0x1e0] sm:$0xff]   ;;  %v1366_v58 = vrot.slane %v2317_v55, 3  ;;  %v2310_v61 = vld [vmem:[%s2647_s1 + $0x208] sm:$0xff]  }
  0x48   : > { %2124 = vmatpush3.bf16.msra.mxu0 %v2269_v49  ;;  %2045 = vmatprep.subr.bf16.mxu1 %v2271_v62  ;;  %v2299_v49 = vld [vmem:[%s2647_s1 + $0xe8] sm:$0xff]  }
  0x49   : > { %2125 = vmatprep.subr.bf16.mxu0 %v2272_v63  ;;  %2059 = vmatprep.mubr.bf16.mxu1 %v489_v7 }
  0x4a   : > { %2139 = vmatprep.mubr.bf16.mxu0 %v1071_v12  ;;  %v1497_v12 = vadd.s32 8, %v1496_v6 }
  0x4b   : > { %2046 = vmatpush3.bf16.msra.mxu1 %v2271_v62  ;;  %v1368_v62 = vsel %vm1365_vm2, %v1366_v58, %v1367_v59 }
  0x4c   : > { %2126 = vmatpush3.bf16.msra.mxu0 %v2272_v63  ;;  %2047 = vmatprep.subr.bf16.mxu1 %v2273_v10  ;;  %v2311_v63 = vld [vmem:[%s2647_s1 + $0x210] sm:$0xff]  }
  0x4d   : > { %2127 = vmatprep.subr.bf16.mxu0 %v2274_v11 }
  0x4f   : > { %2048 = vmatpush3.bf16.msra.mxu1 %v2273_v10 }
  0x50   : > { %2128 = vmatpush3.bf16.msra.mxu0 %v2274_v11  ;;  %2049 = vmatprep.subr.bf16.mxu1 %v2275_v13 }
  0x51   : > { %2129 = vmatprep.subr.bf16.mxu0 %v2276_v14 }
  0x53   : > { %2050 = vmatpush3.bf16.msra.mxu1 %v2275_v13 }
  0x54   : > { %2130 = vmatpush3.bf16.msra.mxu0 %v2276_v14  ;;  %2051 = vmatprep.subr.bf16.mxu1 %v2277_v15  ;;  %v2617_v13 = vmul.u32.u64.low 3435973837, %v1498_v8  ;;  %v2618_v14 = vmul.u32.u64.high 3435973837, %v1498_v8, %v2617_v13 }
  0x55   : > { %2131 = vmatprep.subr.bf16.mxu0 %v2278_v16 }
  0x56   : > { %v1527_v19 = vshrl.u32 %v2618_v14, 2 }
  0x57   : > { %2052 = vmatpush3.bf16.msra.mxu1 %v2277_v15 }
  0x58   : > { %2132 = vmatpush3.bf16.msra.mxu0 %v2278_v16  ;;  %2053 = vmatprep.subr.bf16.mxu1 %v2279_v17  ;;  %v2620_v15 = vmul.u32.u64.low 3435973837, %v1496_v6  ;;  %v2621_v16 = vmul.u32.u64.high 3435973837, %v1496_v6, %v2620_v15 }
  0x59   : > { %2133 = vmatprep.subr.bf16.mxu0 %v2280_v18 }
  0x5a   : > { %v1505_v20 = vshrl.u32 %v2621_v16, 2 }
  0x5b   : > { %2054 = vmatpush3.bf16.msra.mxu1 %v2279_v17 }
  0x5c   : > { %2134 = vmatpush3.bf16.msra.mxu0 %v2280_v18  ;;  %2055 = vmatprep.subr.bf16.mxu1 %v2281_v21  ;;  %v2623_v17 = vmul.u32.u64.low 3435973837, %v1497_v12  ;;  %v2624_v18 = vmul.u32.u64.high 3435973837, %v1497_v12, %v2623_v17  ;;  %v1506_v23 = vmul.u32 5, %v1505_v20 }
  0x5d   : > { %2135 = vmatprep.subr.bf16.mxu0 %v2282_v22 }
  0x5e   : > { %v1507_v26 = vsub.s32 %v1496_v6, %v1506_v23 }
  0x5f   : > { %2056 = vmatpush3.bf16.msra.mxu1 %v2281_v21  ;;  %v1516_v21 = vshrl.u32 %v2624_v18, 2 }
  0x60   : > { %2136 = vmatpush3.bf16.msra.mxu0 %v2282_v22  ;;  %2057 = vmatprep.subr.bf16.mxu1 %v2283_v27  ;;  %v1528_v22 = vmul.u32 5, %v1527_v19  ;;  %vm1532_vm5 = vcmp.ne.s32.totalorder %v1507_v26, 0  ;;  %vm1535_vm6 = vcmp.lt.s32.totalorder %v1507_v26, 0  ;;  %v1541_v29 = vadd.s32 5, %v1507_v26 }
  0x61   : > { %2137 = vmatprep.subr.bf16.mxu0 %v2284_v28  ;;  %v1517_v24 = vmul.u32 5, %v1516_v21  ;;  %vm1538_vm10 = vmand %vm1535_vm6, %vm1532_vm5 }
  0x62   : > { %v1529_v25 = vsub.s32 %v1498_v8, %v1528_v22  ;;  %v1544_v33 = vsel %vm1538_vm10, %v1541_v29, %v1507_v26 }
  0x63   : > { %2058 = vmatpush3.bf16.msra.mxu1 %v2283_v27  ;;  %v1518_v27 = vsub.s32 %v1497_v12, %v1517_v24  ;;  %vm1547_vm14 = vcmp.lt.s32.totalorder %v1544_v33, 4 }
  0x64   : > { %2138 = vmatpush3.bf16.msra.mxu0 %v2284_v28  ;;  %2063 = vmatprep.subr.bf16.mxu1 %v2287_v34  ;;  %vm1534_vm3 = vcmp.ne.s32.totalorder %v1529_v25, 0  ;;  %vm1537_vm4 = vcmp.lt.s32.totalorder %v1529_v25, 0  ;;  %v1543_v28 = vadd.s32 5, %v1529_v25 }
  0x65   : > { %2143 = vmatprep.subr.bf16.mxu0 %v2290_v35  ;;  %vm1540_vm7 = vmand %vm1537_vm4, %vm1534_vm3  ;;  %vm1533_vm8 = vcmp.ne.s32.totalorder %v1518_v27, 0  ;;  %vm1536_vm9 = vcmp.lt.s32.totalorder %v1518_v27, 0  ;;  %v1542_v30 = vadd.s32 5, %v1518_v27 }
  0x66   : > { %2060 = vmatmul.mubr.bf16.vlgmr.msra.gmra.mrb[0].mxu1 %v492_v36  ;;  %v1546_v31 = vsel %vm1540_vm7, %v1543_v28, %v1529_v25  ;;  %vm2629_vm11 = vmand %vm1536_vm9, %vm1533_vm8 }
  0x67   : > { %2064 = vmatpush3.bf16.msra.mxu1 %v2287_v34  ;;  %2140 = vmatmul.mubr.bf16.vlgmr.msra.gmra.mrb[0].mxu0 %v2491_v9  ;;  %vm1549_vm12 = vcmp.lt.s32.totalorder %v1546_v31, 4 }
  0x68   : > { %2144 = vmatpush3.bf16.msra.mxu0 %v2290_v35  ;;  %2065 = vmatprep.subr.bf16.mxu1 %v2291_v39  ;;  %v1545_v35 = vsel %vm2629_vm11, %v1542_v30, %v1518_v27  ;;  %vm1555_vm15 = vmand %vm1549_vm12, %vm1552_vm13 }
  0x69   : > { %2145 = vmatprep.subr.bf16.mxu0 %v2292_v40  ;;  %2079 = vmatprep.mubr.bf16.mxu1 %v2305_v41  ;;  %vm1548_vm0 = vcmp.lt.s32.totalorder %v1545_v35, 4 }
  0x6a   : > { %2159 = vmatprep.mubr.bf16.mxu0 %v1226_v42 }
  0x6b   : > { %2066 = vmatpush3.bf16.msra.mxu1 %v2291_v39 }
  0x6c   : > { %2146 = vmatpush3.bf16.msra.mxu0 %v2292_v40  ;;  %2067 = vmatprep.subr.bf16.mxu1 %v2293_v43 }
  0x6d   : > { %2147 = vmatprep.subr.bf16.mxu0 %v2294_v44 }
  0x6f   : > { %2068 = vmatpush3.bf16.msra.mxu1 %v2293_v43 }
  0x70   : > { %2148 = vmatpush3.bf16.msra.mxu0 %v2294_v44  ;;  %2069 = vmatprep.subr.bf16.mxu1 %v2295_v45 }
  0x71   : > { %2149 = vmatprep.subr.bf16.mxu0 %v2296_v46 }
  0x73   : > { %2070 = vmatpush3.bf16.msra.mxu1 %v2295_v45 }
  0x74   : > { %2150 = vmatpush3.bf16.msra.mxu0 %v2296_v46  ;;  %2071 = vmatprep.subr.bf16.mxu1 %v2297_v47 }
  0x75   : > { %2151 = vmatprep.subr.bf16.mxu0 %v2298_v48 }
  0x77   : > { %2072 = vmatpush3.bf16.msra.mxu1 %v2297_v47 }
  0x78   : > { %2152 = vmatpush3.bf16.msra.mxu0 %v2298_v48  ;;  %2073 = vmatprep.subr.bf16.mxu1 %v2299_v49 }
  0x79   : > { %2153 = vmatprep.subr.bf16.mxu0 %v2300_v50 }
  0x7b   : > { %2074 = vmatpush3.bf16.msra.mxu1 %v2299_v49 }
  0x7c   : > { %2154 = vmatpush3.bf16.msra.mxu0 %v2300_v50  ;;  %2075 = vmatprep.subr.bf16.mxu1 %v2301_v51 }
  0x7d   : > { %2155 = vmatprep.subr.bf16.mxu0 %v2302_v52 }
  0x7f   : > { %2076 = vmatpush3.bf16.msra.mxu1 %v2301_v51 }
  0x80   : > { %2156 = vmatpush3.bf16.msra.mxu0 %v2302_v52  ;;  %2077 = vmatprep.subr.bf16.mxu1 %v2303_v53 }
  0x81   : > { %2157 = vmatprep.subr.bf16.mxu0 %v2304_v54 }
  0x83   : > { %2078 = vmatpush3.bf16.msra.mxu1 %v2303_v53 }
  0x84   : > { %2158 = vmatpush3.bf16.msra.mxu0 %v2304_v54 }
  0x85   : > { %2163 = vmatprep.subr.bf16.mxu0 %v2309_v57 }
  0x86   : > { %2080 = vmatmul.mubr.bf16.vlgmr.msra.gmra.mrb[0].mxu1 %v2306_v60 }
  0x87   : > { %2160 = vmatmul.mubr.bf16.vlgmr.msra.gmra.mrb[0].mxu0 %v2541_v38 }
  0x88   : > { %2164 = vmatpush3.bf16.msra.mxu0 %v2309_v57  ;;  %2179 = vmatprep.mubr.bf16.mxu0 %v1368_v62 }
  0x89   : > { %2165 = vmatprep.subr.bf16.mxu0 %v2310_v61 }
  0x8c   : > { %2166 = vmatpush3.bf16.msra.mxu0 %v2310_v61 }
  0x8d   : > { %2167 = vmatprep.subr.bf16.mxu0 %v2311_v63 }
  0x90   : > { %2168 = vmatpush3.bf16.msra.mxu0 %v2311_v63 }
  0x91   : > { %2169 = vmatprep.subr.bf16.mxu0 %v2312_v0 }
  0x94   : > { %2170 = vmatpush3.bf16.msra.mxu0 %v2312_v0 }
  0x95   : > { %2171 = vmatprep.subr.bf16.mxu0 %v2313_v1 }
  0x98   : > { %2172 = vmatpush3.bf16.msra.mxu0 %v2313_v1 }
  0x99   : > { %2173 = vmatprep.subr.bf16.mxu0 %v2314_v2 }
  0x9c   : > { %2174 = vmatpush3.bf16.msra.mxu0 %v2314_v2 }
  0x9d   : > { %2175 = vmatprep.subr.bf16.mxu0 %v2315_v3 }
  0xa0   : > { %2176 = vmatpush3.bf16.msra.mxu0 %v2315_v3 }
  0xa1   : > { %2177 = vmatprep.subr.bf16.mxu0 %v2316_v4 }
  0xa4   : > { %2178 = vmatpush3.bf16.msra.mxu0 %v2316_v4 }
  0xa7   : > { %2180 = vmatmul.mubr.bf16.vlgmr.msra.gmra.mrb[0].mxu0 %v1367_v59 }
 0x159   : > { %v2081_v7 = vpop.f32.mrb[0].mxu1 }
 0x15a   : > { %v712_v9 = vpop.f32.mrb[1].mxu1 }
 0x15b   : > { %v2082_v10 = vpop.f32.mrb[2].mxu1 }
 0x15c   : > { %v715_v11 = vpop.f32.mrb[3].mxu1 }
 0x17a   : > { %v2181_v34 = vpop.f32.mrb[0].mxu0 }
 0x17b   : > { %v2183_v36 = vadd.f32 %v2181_v34, %v2081_v7  ;;  %v1453_v37 = vpop.f32.mrb[1].mxu0 }
 0x17c   : > { %v2184_v38 = vadd.f32 %v1453_v37, %v712_v9  ;;  %v2182_v39 = vpop.f32.mrb[2].mxu0 }
 0x17d   : > { %v1907_v40 = vpack.c.bf16 %v2183_v36, %v2183_v36  ;;  %v1456_v41 = vpop.f32.mrb[3].mxu0  ;;  %v1564_v44 = vsel %vm1555_vm15, %v2183_v36, 0.0 }
 0x17e   : > { %v1562_v42 = vsel %vm1547_vm14, %v2184_v38, 0.0  ;;  %v2185_v43 = vadd.f32 %v1456_v41, %v715_v11  ;;  %v1576_v50 = vmul.f32 %v1564_v44, %v1564_v44 }
 0x17f   : > { %1494 = vst [vmem:[%s177_s19 + $0x8] sm:$0xf] %v1907_v40  ;;  %v1574_v47 = vmul.f32 %v1562_v42, %v1562_v42 }
 0x180   : > { %v1911_v45 = vpack.c.bf16 %v2185_v43, %v2184_v38  ;;  %v1563_v46 = vsel %vm1548_vm0, %v2185_v43, 0.0 }
 0x181   : > { %v1565_v48 = vadd.f32 %v1563_v46, %v1562_v42  ;;  %v1575_v49 = vmul.f32 %v1563_v46, %v1563_v46 }
 0x182   : > { %1912 = vst [vmem:[%s177_s19] sm:$0xff] %v1911_v45  }
 0x183   : > { %v1566_v51 = vadd.f32 %v1565_v48, %v1564_v44  ;;  %v1577_v52 = vadd.f32 %v1575_v49, %v1574_v47 }
 0x185   : > { %v1567_v53 = vrot.slane %v1566_v51, 4  ;;  %v1578_v54 = vadd.f32 %v1577_v52, %v1576_v50 }
 0x187   : > { %v1568_v55 = vadd.f32 %v1567_v53, %v1566_v51  ;;  %v1579_v56 = vrot.slane %v1578_v54, 4 }
 0x189   : > { %v1569_v57 = vrot.slane %v1568_v55, 2  ;;  %v1580_v58 = vadd.f32 %v1579_v56, %v1578_v54 }
 0x18b   : > { %v1570_v59 = vadd.f32 %v1569_v57, %v1568_v55  ;;  %v1581_v60 = vrot.slane %v1580_v58, 2 }
 0x18d   : > { %v1571_v61 = vrot.slane %v1570_v59, 1  ;;  %v1582_v62 = vadd.f32 %v1581_v60, %v1580_v58 }
 0x18f   : > { %v1572_v63 = vadd.f32 %v1571_v61, %v1570_v59  ;;  %v1583_v0 = vrot.slane %v1582_v62, 1 }
 0x191   : > { %1573 = vst [vmem:[%s181_s23] sm:$0x1] %v1572_v63  ;;  %v1584_v1 = vadd.f32 %v1583_v0, %v1582_v62 }
 0x193   : > { %1585 = vst [vmem:[%s181_s23 + $0x1] sm:$0x1] %v1584_v1 }
 0x194 PF: > { %s14_s12 = sadd.s32 1, %s2325_s12  }
 0x195   : > { %p11_p4 = scmp.ge.s32.totalorder %s14_s12, 4  }
 0x197   :  { %13 = sbr.rel (!%p11_p4) target bundleno = 1 (0x1), region = 78 }

</bundles_post_ra>
